<compile_context>
chip_gen: v5e
topology: v5e:2x2
jax: 0.10.0
libtpu: 0.0.40
codegen_flags: <defaults>
</compile_context>

<pallas_src>
import functools

import jax
import jax.numpy as jnp
from jax.experimental import pallas as pl
from jax.experimental.pallas import tpu as pltpu


def _round_up(v, m):
    return (v + m - 1) // m * m


def _pyramid_kernel(x_ref, w_ref, b_ref, o_ref, col_ref, *, K, Wp, Cpad, Mseg, Nb):
    # x_ref  : (Nb, Cpad, L)       bf16 channel-major flattened padded images
    # w_ref  : (K, Copad, K*Cpad)  bf16 block-diagonal taps, leading dim = dx
    # b_ref  : (Copad, 1)          f32 concatenated bias (padded rows are 0)
    # o_ref  : (Nb, Copad, Mseg)   f32 wide output (cols >= Wo per row are junk)
    # col_ref: (K*Cpad, Nb*Mseg)   bf16 im2col: K dy-shifted bands per batch segment
    Mtot = Nb * Mseg

    # im2col build: sublane-(16) and lane-(128) aligned dense writes at full
    # segment width; the only misaligned accesses left are the dy*Wp-offset
    # reads of the resident image (extra zero rows keep them in bounds).
    for nb in range(Nb):
        for dy in range(K):
            col_ref[dy * Cpad:(dy + 1) * Cpad, nb * Mseg:nb * Mseg + Mseg] = (
                x_ref[nb, :, dy * Wp:dy * Wp + Mseg])

    col = col_ref[...]
    # One contraction-(K*Cpad) matmul per tap column dx.  The +dx column shift
    # is applied to the f32 partial with an XLU roll (kept columns never cross
    # a batch segment, so the circular wrap only lands in junk columns >= M).
    acc = jnp.dot(w_ref[0], col, preferred_element_type=jnp.float32)
    for dx in range(1, K):
        part = jnp.dot(w_ref[dx], col, preferred_element_type=jnp.float32)
        acc = acc + pltpu.roll(part, shift=Mtot - dx, axis=1)
    acc = acc + b_ref[...]

    # Lane/sublane-dense output stores, one (Copad, Mseg) slab per batch element.
    for nb in range(Nb):
        o_ref[nb] = acc[:, nb * Mseg:(nb + 1) * Mseg].astype(o_ref.dtype)


def pack_pyramid_params(params, compute_dtype=jnp.bfloat16):
    """Pack the 3 branch convs into one block-diagonal k7/pad2 tap tensor.

    Called ONCE outside the forward path (hoists the scatter/transpose/reshape
    out of every forward call).
    """
    w1, w2, w3 = params["w1"], params["w2"], params["w3"]
    K = 7
    Cb, Cob = w1.shape[2], w1.shape[3]
    Cin, Cout = 3 * Cb, 3 * Cob
    Cpad, Copad = _round_up(Cin, 8), _round_up(Cout, 8)

    # Branch b (kernel kb) occupies taps [off, off+kb) with off = (K-kb)//2 and
    # the (ci, co) block [b*Cb:(b+1)*Cb, b*Cob:(b+1)*Cob]; everything else is 0.
    w_big = jnp.zeros((K, K, Cpad, Copad), compute_dtype)
    for b, w in enumerate((w1, w2, w3)):
        kb = w.shape[0]
        off = (K - kb) // 2                      # reproduces each branch's padding
        w_big = w_big.at[off:off + kb, off:off + kb,
                         b * Cb:(b + 1) * Cb,
                         b * Cob:(b + 1) * Cob].set(w.astype(compute_dtype))
    # -> (dx, Copad, dy*Cpad + ci): one contraction-(K*Cpad) matmul per dx.
    w_stack = jnp.transpose(w_big, (1, 3, 0, 2)).reshape(K, Copad, K * Cpad)

    b_cat = jnp.concatenate([params["b1"], params["b2"], params["b3"]]
                            ).astype(jnp.float32)
    bias = jnp.zeros((Copad, 1), jnp.float32).at[:Cout, 0].set(b_cat)
    return w_stack, bias


def pyramid_conv(x, w_stack, bias, *, cout):
    """x: (N, C, H, W) NCHW, C divisible by 3. Returns (N, cout, H-2, W-2)."""
    N, C, H, W = x.shape
    K = w_stack.shape[0]
    Copad = w_stack.shape[1]
    Cpad = w_stack.shape[2] // K
    pad = 2                               # unified geometry = largest branch (k7, pad 2)
    Hp, Wp = H + 2 * pad, W + 2 * pad
    Ho, Wo = Hp - K + 1, Wp - K + 1       # all three branches share this output size
    M = Ho * Wp                           # valid wide-output columns per image
    Mseg = _round_up(M + K - 1, 128)      # lane-dense per-batch segment width
    # Enough zero rows below the image that every dy band can be copied at the
    # full Mseg width (keeps all im2col writes dense and the scratch junk-free).
    extra_rows = max(0, -(-((K - 1) * Wp + Mseg - Hp * Wp) // Wp))
    L = (Hp + extra_rows) * Wp

    # Batch elements per grid step, stacked along the matmul lane axis.
    Nb = max(1, min(N, max(1, 1024 // Mseg)))
    while N % Nb:
        Nb -= 1

    # bf16 operands (MXU-native); zero-pad channels + spatial once and flatten
    # row-major so the kernel is channel-major end to end (no transposes).
    xp = jnp.pad(x.astype(jnp.bfloat16),
                 ((0, 0), (0, Cpad - C), (pad, pad + extra_rows), (pad, pad)))
    x_flat = xp.reshape(N, Cpad, L)

    kernel = functools.partial(_pyramid_kernel, K=K, Wp=Wp, Cpad=Cpad,
                               Mseg=Mseg, Nb=Nb)
    y_wide = pl.pallas_call(
        kernel,
        out_shape=jax.ShapeDtypeStruct((N, Copad, Mseg), jnp.float32),
        grid=(N // Nb,),
        in_specs=[
            pl.BlockSpec((Nb, Cpad, L), lambda g: (g, 0, 0)),
            pl.BlockSpec((K, Copad, K * Cpad), lambda g: (0, 0, 0)),
            pl.BlockSpec((Copad, 1), lambda g: (0, 0)),
        ],
        out_specs=pl.BlockSpec((Nb, Copad, Mseg), lambda g: (g, 0, 0)),
        scratch_shapes=[pltpu.VMEM((K * Cpad, Nb * Mseg), jnp.bfloat16)],
        compiler_params=pltpu.CompilerParams(
            dimension_semantics=("parallel",)),
    )(x_flat, w_stack, bias)

    # Strip channel / lane padding and the phantom columns (>= Wo).
    return y_wide[:, :cout, :M].reshape(N, cout, Ho, Wp)[..., :Wo]


def _ref_conv(x_nchw, w_hwio, b, pad):
    w_oihw = jnp.transpose(w_hwio, (3, 2, 0, 1))
    y = jax.lax.conv_general_dilated(
        x_nchw, w_oihw, window_strides=(1, 1),
        padding=[(pad, pad), (pad, pad)],
        dimension_numbers=("NCHW", "OIHW", "NCHW"),
        preferred_element_type=jnp.float32)
    return y + b[None, :, None, None].astype(jnp.float32)


if __name__ == "__main__":
    key = jax.random.PRNGKey(0)
    N, Cin, H, W = 2, 12, 16, 16          # in_channels = out_channels = 12
    Cout = 12
    cb_in, cb_out = Cin // 3, Cout // 3   # per-branch channels = 4

    ks = jax.random.split(key, 7)
    x = jax.random.normal(ks[0], (N, Cin, H, W), jnp.float32)
    params = {
        "w1": 0.1 * jax.random.normal(ks[1], (3, 3, cb_in, cb_out), jnp.float32),
        "b1": 0.1 * jax.random.normal(ks[2], (cb_out,), jnp.float32),
        "w2": 0.1 * jax.random.normal(ks[3], (5, 5, cb_in, cb_out), jnp.float32),
        "b2": 0.1 * jax.random.normal(ks[4], (cb_out,), jnp.float32),
        "w3": 0.1 * jax.random.normal(ks[5], (7, 7, cb_in, cb_out), jnp.float32),
        "b3": 0.1 * jax.random.normal(ks[6], (cb_out,), jnp.float32),
    }

    w_stack, bias = pack_pyramid_params(params)     # packed once, outside jit
    fwd = jax.jit(functools.partial(pyramid_conv, cout=Cout))
    out = jax.block_until_ready(fwd(x, w_stack, bias))
    assert out.shape == (N, Cout, H - 2, W - 2), out.shape

    # Reference: XLA convs on the SAME bf16-cast operands, f32 accumulation.
    xb = x.astype(jnp.bfloat16)
    ref = jnp.concatenate([
        _ref_conv(xb[:, 0:cb_in], params["w1"].astype(jnp.bfloat16),
                  params["b1"], 0),
        _ref_conv(xb[:, cb_in:2 * cb_in], params["w2"].astype(jnp.bfloat16),
                  params["b2"], 1),
        _ref_conv(xb[:, 2 * cb_in:], params["w3"].astype(jnp.bfloat16),
                  params["b3"], 2),
    ], axis=1)
    assert jnp.allclose(out, ref, atol=2e-2, rtol=2e-2), \
        float(jnp.max(jnp.abs(out - ref)))

    print("KERNEL_OK")
</pallas_src>

<mosaic_0001>
module attributes {stable_mosaic.version = 11 : i64} {
  func.func @_pyramid_kernel(%arg0: i32, %arg1: memref<2x16x520xbf16, #tpu.memory_space<vmem>>, %arg2: memref<7x16x112xbf16, #tpu.memory_space<vmem>>, %arg3: memref<16x1xf32, #tpu.memory_space<vmem>>, %arg4: memref<2x16x384xf32, #tpu.memory_space<vmem>>, %arg5: memref<112x768xbf16, #tpu.memory_space<vmem>>) attributes {dimension_semantics = [#tpu.dimension_semantics<parallel>], iteration_bounds = array<i64: 1>, scalar_prefetch = 0 : i64, scratch_operands = 1 : i64, tpu.core_type = #tpu.core_type<tc>, window_params = [{transform_indices = @transform_0, window_bounds = array<i64: 2, 16, 520>}, {pipeline_mode = #tpu.pipeline_mode<synchronous>, transform_indices = @transform_1, window_bounds = array<i64: 7, 16, 112>}, {pipeline_mode = #tpu.pipeline_mode<synchronous>, transform_indices = @transform_2, window_bounds = array<i64: 16, 1>}, {transform_indices = @transform_3, window_bounds = array<i64: 2, 16, 384>}]} {
    %c0 = arith.constant 0 : index
    %c0_0 = arith.constant 0 : index
    %c0_1 = arith.constant 0 : index
    %0 = vector.load %arg1[%c0, %c0_0, %c0_1] : memref<2x16x520xbf16, #tpu.memory_space<vmem>>, vector<1x16x384xbf16>
    %1 = vector.shape_cast %0 : vector<1x16x384xbf16> to vector<16x384xbf16>
    %c0_2 = arith.constant 0 : index
    %c0_3 = arith.constant 0 : index
    %2 = vector.load %arg5[%c0_2, %c0_3] : memref<112x768xbf16, #tpu.memory_space<vmem>>, vector<16x384xbf16>
    tpu.vector_store %arg5[%c0_2, %c0_3], %1 {strides = array<i32>} : memref<112x768xbf16, #tpu.memory_space<vmem>>, vector<16x384xbf16>,
    %c0_4 = arith.constant 0 : index
    %c0_5 = arith.constant 0 : index
    %c20 = arith.constant 20 : index
    %3 = vector.load %arg1[%c0_4, %c0_5, %c20] : memref<2x16x520xbf16, #tpu.memory_space<vmem>>, vector<1x16x384xbf16>
    %4 = vector.shape_cast %3 : vector<1x16x384xbf16> to vector<16x384xbf16>
    %c16 = arith.constant 16 : index
    %c0_6 = arith.constant 0 : index
    %5 = vector.load %arg5[%c16, %c0_6] : memref<112x768xbf16, #tpu.memory_space<vmem>>, vector<16x384xbf16>
    tpu.vector_store %arg5[%c16, %c0_6], %4 {strides = array<i32>} : memref<112x768xbf16, #tpu.memory_space<vmem>>, vector<16x384xbf16>,
    %c0_7 = arith.constant 0 : index
    %c0_8 = arith.constant 0 : index
    %c40 = arith.constant 40 : index
    %6 = vector.load %arg1[%c0_7, %c0_8, %c40] : memref<2x16x520xbf16, #tpu.memory_space<vmem>>, vector<1x16x384xbf16>
    %7 = vector.shape_cast %6 : vector<1x16x384xbf16> to vector<16x384xbf16>
    %c32 = arith.constant 32 : index
    %c0_9 = arith.constant 0 : index
    %8 = vector.load %arg5[%c32, %c0_9] : memref<112x768xbf16, #tpu.memory_space<vmem>>, vector<16x384xbf16>
    tpu.vector_store %arg5[%c32, %c0_9], %7 {strides = array<i32>} : memref<112x768xbf16, #tpu.memory_space<vmem>>, vector<16x384xbf16>,
    %c0_10 = arith.constant 0 : index
    %c0_11 = arith.constant 0 : index
    %c60 = arith.constant 60 : index
    %9 = vector.load %arg1[%c0_10, %c0_11, %c60] : memref<2x16x520xbf16, #tpu.memory_space<vmem>>, vector<1x16x384xbf16>
    %10 = vector.shape_cast %9 : vector<1x16x384xbf16> to vector<16x384xbf16>
    %c48 = arith.constant 48 : index
    %c0_12 = arith.constant 0 : index
    %11 = vector.load %arg5[%c48, %c0_12] : memref<112x768xbf16, #tpu.memory_space<vmem>>, vector<16x384xbf16>
    tpu.vector_store %arg5[%c48, %c0_12], %10 {strides = array<i32>} : memref<112x768xbf16, #tpu.memory_space<vmem>>, vector<16x384xbf16>,
    %c0_13 = arith.constant 0 : index
    %c0_14 = arith.constant 0 : index
    %c80 = arith.constant 80 : index
    %12 = vector.load %arg1[%c0_13, %c0_14, %c80] : memref<2x16x520xbf16, #tpu.memory_space<vmem>>, vector<1x16x384xbf16>
    %13 = vector.shape_cast %12 : vector<1x16x384xbf16> to vector<16x384xbf16>
    %c64 = arith.constant 64 : index
    %c0_15 = arith.constant 0 : index
    %14 = vector.load %arg5[%c64, %c0_15] : memref<112x768xbf16, #tpu.memory_space<vmem>>, vector<16x384xbf16>
    tpu.vector_store %arg5[%c64, %c0_15], %13 {strides = array<i32>} : memref<112x768xbf16, #tpu.memory_space<vmem>>, vector<16x384xbf16>,
    %c0_16 = arith.constant 0 : index
    %c0_17 = arith.constant 0 : index
    %c100 = arith.constant 100 : index
    %15 = vector.load %arg1[%c0_16, %c0_17, %c100] : memref<2x16x520xbf16, #tpu.memory_space<vmem>>, vector<1x16x384xbf16>
    %16 = vector.shape_cast %15 : vector<1x16x384xbf16> to vector<16x384xbf16>
    %c80_18 = arith.constant 80 : index
    %c0_19 = arith.constant 0 : index
    %17 = vector.load %arg5[%c80_18, %c0_19] : memref<112x768xbf16, #tpu.memory_space<vmem>>, vector<16x384xbf16>
    tpu.vector_store %arg5[%c80_18, %c0_19], %16 {strides = array<i32>} : memref<112x768xbf16, #tpu.memory_space<vmem>>, vector<16x384xbf16>,
    %c0_20 = arith.constant 0 : index
    %c0_21 = arith.constant 0 : index
    %c120 = arith.constant 120 : index
    %18 = vector.load %arg1[%c0_20, %c0_21, %c120] : memref<2x16x520xbf16, #tpu.memory_space<vmem>>, vector<1x16x384xbf16>
    %19 = vector.shape_cast %18 : vector<1x16x384xbf16> to vector<16x384xbf16>
    %c96 = arith.constant 96 : index
    %c0_22 = arith.constant 0 : index
    %20 = vector.load %arg5[%c96, %c0_22] : memref<112x768xbf16, #tpu.memory_space<vmem>>, vector<16x384xbf16>
    tpu.vector_store %arg5[%c96, %c0_22], %19 {strides = array<i32>} : memref<112x768xbf16, #tpu.memory_space<vmem>>, vector<16x384xbf16>,
    %c1 = arith.constant 1 : index
    %c0_23 = arith.constant 0 : index
    %c0_24 = arith.constant 0 : index
    %21 = vector.load %arg1[%c1, %c0_23, %c0_24] : memref<2x16x520xbf16, #tpu.memory_space<vmem>>, vector<1x16x384xbf16>
    %22 = vector.shape_cast %21 : vector<1x16x384xbf16> to vector<16x384xbf16>
    %c0_25 = arith.constant 0 : index
    %c384 = arith.constant 384 : index
    %23 = vector.load %arg5[%c0_25, %c384] : memref<112x768xbf16, #tpu.memory_space<vmem>>, vector<16x384xbf16>
    tpu.vector_store %arg5[%c0_25, %c384], %22 {strides = array<i32>} : memref<112x768xbf16, #tpu.memory_space<vmem>>, vector<16x384xbf16>,
    %c1_26 = arith.constant 1 : index
    %c0_27 = arith.constant 0 : index
    %c20_28 = arith.constant 20 : index
    %24 = vector.load %arg1[%c1_26, %c0_27, %c20_28] : memref<2x16x520xbf16, #tpu.memory_space<vmem>>, vector<1x16x384xbf16>
    %25 = vector.shape_cast %24 : vector<1x16x384xbf16> to vector<16x384xbf16>
    %c16_29 = arith.constant 16 : index
    %c384_30 = arith.constant 384 : index
    %26 = vector.load %arg5[%c16_29, %c384_30] : memref<112x768xbf16, #tpu.memory_space<vmem>>, vector<16x384xbf16>
    tpu.vector_store %arg5[%c16_29, %c384_30], %25 {strides = array<i32>} : memref<112x768xbf16, #tpu.memory_space<vmem>>, vector<16x384xbf16>,
    %c1_31 = arith.constant 1 : index
    %c0_32 = arith.constant 0 : index
    %c40_33 = arith.constant 40 : index
    %27 = vector.load %arg1[%c1_31, %c0_32, %c40_33] : memref<2x16x520xbf16, #tpu.memory_space<vmem>>, vector<1x16x384xbf16>
    %28 = vector.shape_cast %27 : vector<1x16x384xbf16> to vector<16x384xbf16>
    %c32_34 = arith.constant 32 : index
    %c384_35 = arith.constant 384 : index
    %29 = vector.load %arg5[%c32_34, %c384_35] : memref<112x768xbf16, #tpu.memory_space<vmem>>, vector<16x384xbf16>
    tpu.vector_store %arg5[%c32_34, %c384_35], %28 {strides = array<i32>} : memref<112x768xbf16, #tpu.memory_space<vmem>>, vector<16x384xbf16>,
    %c1_36 = arith.constant 1 : index
    %c0_37 = arith.constant 0 : index
    %c60_38 = arith.constant 60 : index
    %30 = vector.load %arg1[%c1_36, %c0_37, %c60_38] : memref<2x16x520xbf16, #tpu.memory_space<vmem>>, vector<1x16x384xbf16>
    %31 = vector.shape_cast %30 : vector<1x16x384xbf16> to vector<16x384xbf16>
    %c48_39 = arith.constant 48 : index
    %c384_40 = arith.constant 384 : index
    %32 = vector.load %arg5[%c48_39, %c384_40] : memref<112x768xbf16, #tpu.memory_space<vmem>>, vector<16x384xbf16>
    tpu.vector_store %arg5[%c48_39, %c384_40], %31 {strides = array<i32>} : memref<112x768xbf16, #tpu.memory_space<vmem>>, vector<16x384xbf16>,
    %c1_41 = arith.constant 1 : index
    %c0_42 = arith.constant 0 : index
    %c80_43 = arith.constant 80 : index
    %33 = vector.load %arg1[%c1_41, %c0_42, %c80_43] : memref<2x16x520xbf16, #tpu.memory_space<vmem>>, vector<1x16x384xbf16>
    %34 = vector.shape_cast %33 : vector<1x16x384xbf16> to vector<16x384xbf16>
    %c64_44 = arith.constant 64 : index
    %c384_45 = arith.constant 384 : index
    %35 = vector.load %arg5[%c64_44, %c384_45] : memref<112x768xbf16, #tpu.memory_space<vmem>>, vector<16x384xbf16>
    tpu.vector_store %arg5[%c64_44, %c384_45], %34 {strides = array<i32>} : memref<112x768xbf16, #tpu.memory_space<vmem>>, vector<16x384xbf16>,
    %c1_46 = arith.constant 1 : index
    %c0_47 = arith.constant 0 : index
    %c100_48 = arith.constant 100 : index
    %36 = vector.load %arg1[%c1_46, %c0_47, %c100_48] : memref<2x16x520xbf16, #tpu.memory_space<vmem>>, vector<1x16x384xbf16>
    %37 = vector.shape_cast %36 : vector<1x16x384xbf16> to vector<16x384xbf16>
    %c80_49 = arith.constant 80 : index
    %c384_50 = arith.constant 384 : index
    %38 = vector.load %arg5[%c80_49, %c384_50] : memref<112x768xbf16, #tpu.memory_space<vmem>>, vector<16x384xbf16>
    tpu.vector_store %arg5[%c80_49, %c384_50], %37 {strides = array<i32>} : memref<112x768xbf16, #tpu.memory_space<vmem>>, vector<16x384xbf16>,
    %c1_51 = arith.constant 1 : index
    %c0_52 = arith.constant 0 : index
    %c120_53 = arith.constant 120 : index
    %39 = vector.load %arg1[%c1_51, %c0_52, %c120_53] : memref<2x16x520xbf16, #tpu.memory_space<vmem>>, vector<1x16x384xbf16>
    %40 = vector.shape_cast %39 : vector<1x16x384xbf16> to vector<16x384xbf16>
    %c96_54 = arith.constant 96 : index
    %c384_55 = arith.constant 384 : index
    %41 = vector.load %arg5[%c96_54, %c384_55] : memref<112x768xbf16, #tpu.memory_space<vmem>>, vector<16x384xbf16>
    tpu.vector_store %arg5[%c96_54, %c384_55], %40 {strides = array<i32>} : memref<112x768xbf16, #tpu.memory_space<vmem>>, vector<16x384xbf16>,
    %c0_56 = arith.constant 0 : index
    %c0_57 = arith.constant 0 : index
    %42 = vector.load %arg5[%c0_56, %c0_57] : memref<112x768xbf16, #tpu.memory_space<vmem>>, vector<112x768xbf16>
    %c0_58 = arith.constant 0 : index
    %c0_59 = arith.constant 0 : index
    %c0_60 = arith.constant 0 : index
    %43 = vector.load %arg2[%c0_58, %c0_59, %c0_60] : memref<7x16x112xbf16, #tpu.memory_space<vmem>>, vector<1x16x112xbf16>
    %44 = vector.shape_cast %43 : vector<1x16x112xbf16> to vector<16x112xbf16>
    %cst = arith.constant dense<0.000000e+00> : vector<16x768xf32>
    %45 = tpu.matmul %44, %42, %cst {dimension_numbers = #tpu.dot_dimension_numbers<[1], [0], [0], [1], [0, 0, 1, 1], [], []>} : vector<16x112xbf16>, vector<112x768xbf16>, vector<16x768xf32> -> vector<16x768xf32>
    %c1_61 = arith.constant 1 : index
    %c0_62 = arith.constant 0 : index
    %c0_63 = arith.constant 0 : index
    %46 = vector.load %arg2[%c1_61, %c0_62, %c0_63] : memref<7x16x112xbf16, #tpu.memory_space<vmem>>, vector<1x16x112xbf16>
    %47 = vector.shape_cast %46 : vector<1x16x112xbf16> to vector<16x112xbf16>
    %cst_64 = arith.constant dense<0.000000e+00> : vector<16x768xf32>
    %48 = tpu.matmul %47, %42, %cst_64 {dimension_numbers = #tpu.dot_dimension_numbers<[1], [0], [0], [1], [0, 0, 1, 1], [], []>} : vector<16x112xbf16>, vector<112x768xbf16>, vector<16x768xf32> -> vector<16x768xf32>
    %c767_i32 = arith.constant 767 : i32
    %49 = tpu.dynamic_rotate %48 by %c767_i32 dim 1 : vector<16x768xf32>, i32 -> vector<16x768xf32>
    %50 = arith.addf %45, %49 : vector<16x768xf32>
    %c2 = arith.constant 2 : index
    %c0_65 = arith.constant 0 : index
    %c0_66 = arith.constant 0 : index
    %51 = vector.load %arg2[%c2, %c0_65, %c0_66] : memref<7x16x112xbf16, #tpu.memory_space<vmem>>, vector<1x16x112xbf16>
    %52 = vector.shape_cast %51 : vector<1x16x112xbf16> to vector<16x112xbf16>
    %cst_67 = arith.constant dense<0.000000e+00> : vector<16x768xf32>
    %53 = tpu.matmul %52, %42, %cst_67 {dimension_numbers = #tpu.dot_dimension_numbers<[1], [0], [0], [1], [0, 0, 1, 1], [], []>} : vector<16x112xbf16>, vector<112x768xbf16>, vector<16x768xf32> -> vector<16x768xf32>
    %c766_i32 = arith.constant 766 : i32
    %54 = tpu.dynamic_rotate %53 by %c766_i32 dim 1 : vector<16x768xf32>, i32 -> vector<16x768xf32>
    %55 = arith.addf %50, %54 : vector<16x768xf32>
    %c3 = arith.constant 3 : index
    %c0_68 = arith.constant 0 : index
    %c0_69 = arith.constant 0 : index
    %56 = vector.load %arg2[%c3, %c0_68, %c0_69] : memref<7x16x112xbf16, #tpu.memory_space<vmem>>, vector<1x16x112xbf16>
    %57 = vector.shape_cast %56 : vector<1x16x112xbf16> to vector<16x112xbf16>
    %cst_70 = arith.constant dense<0.000000e+00> : vector<16x768xf32>
    %58 = tpu.matmul %57, %42, %cst_70 {dimension_numbers = #tpu.dot_dimension_numbers<[1], [0], [0], [1], [0, 0, 1, 1], [], []>} : vector<16x112xbf16>, vector<112x768xbf16>, vector<16x768xf32> -> vector<16x768xf32>
    %c765_i32 = arith.constant 765 : i32
    %59 = tpu.dynamic_rotate %58 by %c765_i32 dim 1 : vector<16x768xf32>, i32 -> vector<16x768xf32>
    %60 = arith.addf %55, %59 : vector<16x768xf32>
    %c4 = arith.constant 4 : index
    %c0_71 = arith.constant 0 : index
    %c0_72 = arith.constant 0 : index
    %61 = vector.load %arg2[%c4, %c0_71, %c0_72] : memref<7x16x112xbf16, #tpu.memory_space<vmem>>, vector<1x16x112xbf16>
    %62 = vector.shape_cast %61 : vector<1x16x112xbf16> to vector<16x112xbf16>
    %cst_73 = arith.constant dense<0.000000e+00> : vector<16x768xf32>
    %63 = tpu.matmul %62, %42, %cst_73 {dimension_numbers = #tpu.dot_dimension_numbers<[1], [0], [0], [1], [0, 0, 1, 1], [], []>} : vector<16x112xbf16>, vector<112x768xbf16>, vector<16x768xf32> -> vector<16x768xf32>
    %c764_i32 = arith.constant 764 : i32
    %64 = tpu.dynamic_rotate %63 by %c764_i32 dim 1 : vector<16x768xf32>, i32 -> vector<16x768xf32>
    %65 = arith.addf %60, %64 : vector<16x768xf32>
    %c5 = arith.constant 5 : index
    %c0_74 = arith.constant 0 : index
    %c0_75 = arith.constant 0 : index
    %66 = vector.load %arg2[%c5, %c0_74, %c0_75] : memref<7x16x112xbf16, #tpu.memory_space<vmem>>, vector<1x16x112xbf16>
    %67 = vector.shape_cast %66 : vector<1x16x112xbf16> to vector<16x112xbf16>
    %cst_76 = arith.constant dense<0.000000e+00> : vector<16x768xf32>
    %68 = tpu.matmul %67, %42, %cst_76 {dimension_numbers = #tpu.dot_dimension_numbers<[1], [0], [0], [1], [0, 0, 1, 1], [], []>} : vector<16x112xbf16>, vector<112x768xbf16>, vector<16x768xf32> -> vector<16x768xf32>
    %c763_i32 = arith.constant 763 : i32
    %69 = tpu.dynamic_rotate %68 by %c763_i32 dim 1 : vector<16x768xf32>, i32 -> vector<16x768xf32>
    %70 = arith.addf %65, %69 : vector<16x768xf32>
    %c6 = arith.constant 6 : index
    %c0_77 = arith.constant 0 : index
    %c0_78 = arith.constant 0 : index
    %71 = vector.load %arg2[%c6, %c0_77, %c0_78] : memref<7x16x112xbf16, #tpu.memory_space<vmem>>, vector<1x16x112xbf16>
    %72 = vector.shape_cast %71 : vector<1x16x112xbf16> to vector<16x112xbf16>
    %cst_79 = arith.constant dense<0.000000e+00> : vector<16x768xf32>
    %73 = tpu.matmul %72, %42, %cst_79 {dimension_numbers = #tpu.dot_dimension_numbers<[1], [0], [0], [1], [0, 0, 1, 1], [], []>} : vector<16x112xbf16>, vector<112x768xbf16>, vector<16x768xf32> -> vector<16x768xf32>
    %c762_i32 = arith.constant 762 : i32
    %74 = tpu.dynamic_rotate %73 by %c762_i32 dim 1 : vector<16x768xf32>, i32 -> vector<16x768xf32>
    %75 = arith.addf %70, %74 : vector<16x768xf32>
    %c0_80 = arith.constant 0 : index
    %c0_81 = arith.constant 0 : index
    %76 = vector.load %arg3[%c0_80, %c0_81] : memref<16x1xf32, #tpu.memory_space<vmem>>, vector<16x1xf32>
    %77 = vector.broadcast %76 : vector<16x1xf32> to vector<16x768xf32>
    %78 = arith.addf %75, %77 : vector<16x768xf32>
    %79 = vector.extract_strided_slice %78 {offsets = [0, 0], sizes = [16, 384], strides = [1, 1]} : vector<16x768xf32> to vector<16x384xf32>
    %c0_82 = arith.constant 0 : index
    %c0_83 = arith.constant 0 : index
    %c0_84 = arith.constant 0 : index
    %80 = vector.load %arg4[%c0_82, %c0_83, %c0_84] : memref<2x16x384xf32, #tpu.memory_space<vmem>>, vector<1x16x384xf32>
    %81 = vector.shape_cast %80 : vector<1x16x384xf32> to vector<16x384xf32>
    %82 = vector.shape_cast %79 : vector<16x384xf32> to vector<1x16x384xf32>
    tpu.vector_store %arg4[%c0_82, %c0_83, %c0_84], %82 {strides = array<i32>} : memref<2x16x384xf32, #tpu.memory_space<vmem>>, vector<1x16x384xf32>,
    %83 = vector.extract_strided_slice %78 {offsets = [0, 384], sizes = [16, 384], strides = [1, 1]} : vector<16x768xf32> to vector<16x384xf32>
    %c1_85 = arith.constant 1 : index
    %c0_86 = arith.constant 0 : index
    %c0_87 = arith.constant 0 : index
    %84 = vector.load %arg4[%c1_85, %c0_86, %c0_87] : memref<2x16x384xf32, #tpu.memory_space<vmem>>, vector<1x16x384xf32>
    %85 = vector.shape_cast %84 : vector<1x16x384xf32> to vector<16x384xf32>
    %86 = vector.shape_cast %83 : vector<16x384xf32> to vector<1x16x384xf32>
    tpu.vector_store %arg4[%c1_85, %c0_86, %c0_87], %86 {strides = array<i32>} : memref<2x16x384xf32, #tpu.memory_space<vmem>>, vector<1x16x384xf32>,
    return
  }
  func.func @transform_0(%arg0: i32) -> (i32, i32, i32) {
    %c0_i32 = arith.constant 0 : i32
    %c0_i32_0 = arith.constant 0 : i32
    %c0_i32_1 = arith.constant 0 : i32
    return %arg0, %c0_i32, %c0_i32_0 : i32, i32, i32
  }
  func.func @transform_1(%arg0: i32) -> (i32, i32, i32) {
    %c0_i32 = arith.constant 0 : i32
    %c0_i32_0 = arith.constant 0 : i32
    %c0_i32_1 = arith.constant 0 : i32
    %c0_i32_2 = arith.constant 0 : i32
    return %c0_i32, %c0_i32_0, %c0_i32_1 : i32, i32, i32
  }
  func.func @transform_2(%arg0: i32) -> (i32, i32) {
    %c0_i32 = arith.constant 0 : i32
    %c0_i32_0 = arith.constant 0 : i32
    %c0_i32_1 = arith.constant 0 : i32
    return %c0_i32, %c0_i32_0 : i32, i32
  }
  func.func @transform_3(%arg0: i32) -> (i32, i32, i32) {
    %c0_i32 = arith.constant 0 : i32
    %c0_i32_0 = arith.constant 0 : i32
    %c0_i32_1 = arith.constant 0 : i32
    return %arg0, %c0_i32, %c0_i32_0 : i32, i32, i32
  }
}

</mosaic_0001>

<bundles_post_ra>
// kernel: pyramid_conv.1
= control target key start
LH: loop header
LB: loop body
LE: loop exit
PB: predicated region body
PF: predicated region fallthrough
CT: control target
= control target key end

     0   :  { %s2037_s16 = smov 8   ;;  %s2038_s17 = smov 28   ;;  %vm43_vm0 = vcmask 1043456   ;;  %vm185_vm1 = vcmask 228352   ;;  %vm150_vm2 = vcmask 392192   ;;  %vm220_vm3 = vcmask 64512   ;;  %s3189_s0 = inlined_call_operand.vmem [shape: bf16[2,16,520], index: 0, kind: input, shape index: {}]   ;;  %s3190_s1 = inlined_call_operand.vmem [shape: bf16[7,16,112], index: 1, kind: input, shape index: {}]   ;;  %s3191_s2 = inlined_call_operand.vmem [shape: f32[16,1], index: 2, kind: input, shape index: {}]   ;;  %s3192_s3 = inlined_call_operand.vmem [shape: f32[2,16,384], index: 3, kind: output, shape index: {}]  }
   0x1   :  { %v201_v0 = vld [vmem:[%s3189_s0 + $0x14] sm:$0xff]  ;;  %v199_v1 = vld [vmem:[%s3189_s0] sm:$0xff]  ;;  %v2080_v2 = vld [vmem:[%s3189_s0 + $0x28] sm:$0xff]  ;;  %s2039_s26 = smov 48   ;;  %s2040_s4 = smov 68   ;;  %vm115_vm4 = vcmask 556032  }
   0x2   :  { %211 = vrot.lane.b32.xlu1 %v201_v0, %s2037_s16  ;;  %207 = vrot.lane.b32.xlu0 %v199_v1, %s2037_s16  ;;  %19 = vst [vmem:[#allocation2] sm:$0xff] %v199_v1  ;;  %v202_v3 = vld [vmem:[%s3189_s0 + $0x1c] sm:$0xff]  ;;  %v200_v4 = vld [vmem:[%s3189_s0 + $0x8] sm:$0xff]  ;;  %s2041_s5 = smov 88   ;;  %s2042_s6 = smov 108   ;;  %vm80_vm5 = vcmask 719872  }
   0x3   :  { %172 = vrot.lane.b32.xlu2 %v199_v1, %s2038_s17  ;;  %21 = vst [vmem:[#allocation2 + $0x18] sm:$0xff] %v201_v0  ;;  %v2095_v5 = vld [vmem:[%s3189_s0 + $0x3c] sm:$0xff]  ;;  %v1714_v6 = vld [vmem:[%s3189_s0 + $0x30] sm:$0xff]  ;;  %v1716_v7 = vld [vmem:[%s3189_s0 + $0x44] sm:$0xff]  ;;  %vm45_vm6 = vcmask 883712   ;;  %vm709_vm7 = vcmask 916480  }
   0x4   :  { %239 = vst [vmem:[#allocation2 + $0xc] sm:$0xff] %v2080_v2  ;;  %s2043_s22 = smov 127   ;;  %s2044_s27 = smov 126  }
   0x5   :  { %241 = vst [vmem:[#allocation2 + $0x24] sm:$0xff] %v2095_v5  ;;  %s2046_s30 = smov 124  }
   0xa   :  { %213 = vrot.lane.b32.xlu1 %v202_v3, %s2037_s16  ;;  %209 = vrot.lane.b32.xlu0 %v200_v4, %s2037_s16 }
   0xb   :  { %174 = vrot.lane.b32.xlu2 %v200_v4, %s2038_s17 }
  0x12   :  { %178 = vrot.lane.b32.xlu1 %v202_v3, %s2038_s17  ;;  %176 = vrot.lane.b32.xlu0 %v201_v0, %s2038_s17 }
  0x13   :  { %137 = vrot.lane.b32.xlu2 %v199_v1, %s2039_s26 }
  0x1a   :  { %141 = vrot.lane.b32.xlu1 %v201_v0, %s2039_s26  ;;  %139 = vrot.lane.b32.xlu0 %v200_v4, %s2039_s26 }
  0x1b   :  { %143 = vrot.lane.b32.xlu2 %v202_v3, %s2039_s26 }
  0x22   :  { %423 = vrot.lane.b32.xlu1 %v1714_v6, %s2037_s16  ;;  %421 = vrot.lane.b32.xlu0 %v2080_v2, %s2037_s16 }
  0x23   :  { %425 = vrot.lane.b32.xlu2 %v2095_v5, %s2037_s16 }
  0x2a   :  { %427 = vrot.lane.b32.xlu0 %v1716_v7, %s2037_s16  ;;  %102 = vrot.lane.b32.xlu1 %v199_v1, %s2040_s4 }
  0x2b   :  { %104 = vrot.lane.b32.xlu2 %v200_v4, %s2040_s4 }
  0x32   :  { %106 = vrot.lane.b32.xlu0 %v201_v0, %s2040_s4  ;;  %108 = vrot.lane.b32.xlu1 %v202_v3, %s2040_s4 }
  0x33   :  { %387 = vrot.lane.b32.xlu2 %v2080_v2, %s2038_s17 }
  0x3a   :  { %389 = vrot.lane.b32.xlu0 %v1714_v6, %s2038_s17  ;;  %391 = vrot.lane.b32.xlu1 %v2095_v5, %s2038_s17 }
  0x3b   :  { %393 = vrot.lane.b32.xlu2 %v1716_v7, %s2038_s17 }
  0x42   :  { %69 = vrot.lane.b32.xlu1 %v200_v4, %s2041_s5  ;;  %67 = vrot.lane.b32.xlu0 %v199_v1, %s2041_s5 }
  0x43   :  { %71 = vrot.lane.b32.xlu2 %v201_v0, %s2041_s5 }
  0x4a   :  { %353 = vrot.lane.b32.xlu1 %v2080_v2, %s2039_s26  ;;  %73 = vrot.lane.b32.xlu0 %v202_v3, %s2041_s5 }
  0x4b   :  { %355 = vrot.lane.b32.xlu2 %v1714_v6, %s2039_s26 }
  0x52   :  { %359 = vrot.lane.b32.xlu1 %v1716_v7, %s2039_s26  ;;  %357 = vrot.lane.b32.xlu0 %v2095_v5, %s2039_s26 }
  0x53   :  { %31 = vrot.lane.b32.xlu2 %v199_v1, %s2042_s6 }
  0x5a   :  { %35 = vrot.lane.b32.xlu1 %v201_v0, %s2042_s6  ;;  %33 = vrot.lane.b32.xlu0 %v200_v4, %s2042_s6 }
  0x5b   :  { %37 = vrot.lane.b32.xlu2 %v202_v3, %s2042_s6 }
  0x5d   :  { %v173_v8 = vpop.permute.xlu2 %172 }
  0x5e   :  { %v180_v9 = vrot.slane %v173_v8, 4 }
  0x62   :  { %321 = vrot.lane.b32.xlu1 %v1714_v6, %s2040_s4  ;;  %319 = vrot.lane.b32.xlu0 %v2080_v2, %s2040_s4 }
  0x63   :  { %323 = vrot.lane.b32.xlu2 %v2095_v5, %s2040_s4 }
  0x65   :  { %v175_v10 = vpop.permute.xlu2 %174 }
  0x66   :  { %v181_v11 = vrot.slane %v175_v10, 4 }
  0x68   :  { %v184_v12 = vsel %vm43_vm0, %v180_v9, %v181_v11  ;;  %v187_v13 = vsel %vm185_vm1, %v175_v10, %v181_v11 }
  0x69   :  { %v186_v14 = vsel %vm185_vm1, %v173_v8, %v184_v12  ;;  %196 = vst [vmem:[#allocation2 + $0xf8] sm:$0xf] %v187_v13 }
  0x6a   :  { %285 = vrot.lane.b32.xlu1 %v2080_v2, %s2041_s5  ;;  %325 = vrot.lane.b32.xlu0 %v1716_v7, %s2040_s4  ;;  %195 = vst [vmem:[#allocation2 + $0xf0] sm:$0xff] %v186_v14  ;;  %s2047_s4 = smov 123  }
  0x6b   :  { %287 = vrot.lane.b32.xlu2 %v1714_v6, %s2041_s5 }
  0x6d   :  { %v2138_v15 = vpop.permute.xlu2 %137 }
  0x6e   :  { %v145_v55 = vrot.slane %v2138_v15, 4 }
  0x70   :  { %v1853_v59 = vld [vmem:[#allocation2 + $0xf8] sm:$0xf] }
  0x71   :  { %v1845_v0 = vld [vmem:[#allocation2 + $0xf0] sm:$0xf]  ;;  %v2003_v1 = vld [vmem:[#allocation2 + $0xf4] sm:$0xf] }
  0x72   :  { %291 = vrot.lane.b32.xlu1 %v1716_v7, %s2041_s5  ;;  %289 = vrot.lane.b32.xlu0 %v2095_v5, %s2041_s5  ;;  %s2048_s5 = smov 122  }
  0x73   :  { %251 = vrot.lane.b32.xlu2 %v2080_v2, %s2042_s6 }
  0x74   :  { %v212_v16 = vpop.permute.xlu1 %211  ;;  %v208_v17 = vpop.permute.xlu0 %207 }
  0x75   :  { %v144_v18 = vpop.permute.xlu2 %143  ;;  %v217_v23 = vrot.slane %v212_v16, 4  ;;  %v215_v24 = vrot.slane %v208_v17, 4 }
  0x76   :  { %v148_v19 = vrot.slane %v144_v18, 4 }
  0x78   :  { %v155_v20 = vsel %vm150_vm2, %v144_v18, %v148_v19 }
  0x79   :  { %163 = vst [vmem:[#allocation2 + $0xe0] sm:$0xf] %v155_v20 }
  0x7a   :  { %255 = vrot.lane.b32.xlu1 %v2095_v5, %s2042_s6  ;;  %253 = vrot.lane.b32.xlu0 %v1714_v6, %s2042_s6 }
  0x7b   :  { %257 = vrot.lane.b32.xlu2 %v1716_v7, %s2042_s6 }
  0x7c   :  { %v214_v21 = vpop.permute.xlu1 %213  ;;  %v210_v22 = vpop.permute.xlu0 %209 }
  0x7d   :  { %v218_v25 = vrot.slane %v214_v21, 4  ;;  %v216_v26 = vrot.slane %v210_v22, 4  ;;  %v2150_v27 = vpop.permute.xlu2 %425 }
  0x7f   :  { %v223_v28 = vsel %vm43_vm0, %v217_v23, %v218_v25  ;;  %v225_v29 = vsel %vm220_vm3, %v214_v21, %v218_v25  ;;  %v219_v30 = vsel %vm43_vm0, %v215_v24, %v216_v26  ;;  %v222_v33 = vsel %vm220_vm3, %v210_v22, %v216_v26 }
  0x80   :  { %v224_v31 = vsel %vm220_vm3, %v212_v16, %v223_v28  ;;  %233 = vst [vmem:[#allocation2 + $0x140] sm:$0xf] %v225_v29  ;;  %v221_v32 = vsel %vm220_vm3, %v208_v17, %v219_v30  ;;  %v2001_v18 = vld [vmem:[#allocation2 + $0xdc] sm:$0xf0] }
  0x81   :  { %232 = vst [vmem:[#allocation2 + $0x138] sm:$0xff] %v224_v31  ;;  %v431_v31 = vrot.slane %v2150_v27, 4 }
  0x82   :  { %230 = vst [vmem:[#allocation2 + $0x120] sm:$0xff] %v221_v32 }
  0x83   :  { %231 = vst [vmem:[#allocation2 + $0x128] sm:$0xf] %v222_v33 }
  0x84   :  { %v179_v34 = vpop.permute.xlu1 %178  ;;  %v177_v35 = vpop.permute.xlu0 %176 }
  0x85   :  { %v183_v36 = vrot.slane %v179_v34, 4  ;;  %v182_v37 = vrot.slane %v177_v35, 4  ;;  %v2158_v38 = vpop.permute.xlu2 %104 }
  0x86   :  { %v111_v39 = vrot.slane %v2158_v38, 4 }
  0x87   :  { %v190_v40 = vsel %vm185_vm1, %v179_v34, %v183_v36  ;;  %v188_v41 = vsel %vm43_vm0, %v182_v37, %v183_v36  ;;  %v2013_v42 = vld [vmem:[#allocation2 + $0x13c] sm:$0xf0] }
  0x88   :  { %198 = vst [vmem:[#allocation2 + $0x110] sm:$0xf] %v190_v40  ;;  %v189_v43 = vsel %vm185_vm1, %v177_v35, %v188_v41  ;;  %v2012_v44 = vld [vmem:[#allocation2 + $0x134] sm:$0xf0]  ;;  %v1871_v45 = vld [vmem:[#allocation2 + $0x138] sm:$0xf0]  ;;  %v117_v46 = vsel %vm115_vm4, %v2158_v38, %v111_v39 }
  0x89   :  { %197 = vst [vmem:[#allocation2 + $0x108] sm:$0xff] %v189_v43  ;;  %v1869_v47 = vld [vmem:[#allocation2 + $0x120] sm:$0xf]  ;;  %v2009_v48 = vld [vmem:[#allocation2 + $0x124] sm:$0xf] }
  0x8a   :  { %v1877_v49 = vld [vmem:[#allocation2 + $0x128] sm:$0xf]  ;;  %v2168_v50 = vor.u32 %v2012_v44, %v1869_v47  ;;  %v2170_v51 = vor.u32 %v2009_v48, %v1871_v45  ;;  %126 = vst [vmem:[#allocation2 + $0x98] sm:$0xf] %v117_v46 }
  0x8b   :  { %v2172_v52 = vor.u32 %v2013_v42, %v1877_v49 }
  0x8c   :  { %714 = vmatpush.bf16.msra.mxu0 %v2168_v50  ;;  %728 = vmatpush.bf16.msra.mxu1 %v2170_v51  ;;  %v142_v53 = vpop.permute.xlu1 %141  ;;  %v140_v54 = vpop.permute.xlu0 %139 }
  0x8d   :  { %742 = vmatpush.bf16.msra.mxu2 %v2172_v52  ;;  %v147_v56 = vrot.slane %v142_v53, 4  ;;  %v146_v57 = vrot.slane %v140_v54, 4  ;;  %v2178_v58 = vpop.permute.xlu2 %387 }
  0x8f   :  { %v153_v60 = vsel %vm43_vm0, %v147_v56, %v148_v19  ;;  %v149_v61 = vsel %vm43_vm0, %v145_v55, %v146_v57  ;;  %v152_v62 = vsel %vm150_vm2, %v140_v54, %v146_v57  ;;  %v2007_v63 = vld [vmem:[#allocation2 + $0x10c] sm:$0xf0]  ;;  %v395_v57 = vrot.slane %v2178_v58, 4 }
  0x90   :  { %v154_v2 = vsel %vm150_vm2, %v142_v53, %v153_v60  ;;  %v151_v3 = vsel %vm150_vm2, %v2138_v15, %v149_v61  ;;  %161 = vst [vmem:[#allocation2 + $0xc8] sm:$0xf] %v152_v62  ;;  %v2186_v4 = vor.u32 %v2007_v63, %v1853_v59  ;;  %v2006_v5 = vld [vmem:[#allocation2 + $0x104] sm:$0xf0]  ;;  %v1847_v6 = vld [vmem:[#allocation2 + $0x108] sm:$0xf0] }
  0x91   :  { %162 = vst [vmem:[#allocation2 + $0xd8] sm:$0xff] %v154_v2  ;;  %v2188_v7 = vor.u32 %v2006_v5, %v1845_v0  ;;  %v2190_v8 = vor.u32 %v2003_v1, %v1847_v6  ;;  %v1805_v62 = vld [vmem:[#allocation2 + $0x98] sm:$0xf] }
  0x92   :  { %160 = vst [vmem:[#allocation2 + $0xc0] sm:$0xff] %v151_v3  ;;  %743 = vmatpush.bf16.msra.mxu2 %v2186_v4 }
  0x93   :  { %715 = vmatpush.bf16.msra.mxu0 %v2188_v7  ;;  %729 = vmatpush.bf16.msra.mxu1 %v2190_v8 }
  0x94   :  { %v424_v9 = vpop.permute.xlu1 %423  ;;  %v422_v10 = vpop.permute.xlu0 %421 }
  0x95   :  { %v430_v11 = vrot.slane %v424_v9, 4  ;;  %v429_v12 = vrot.slane %v422_v10, 4  ;;  %v2195_v13 = vpop.permute.xlu2 %393 }
  0x96   :  { %v398_v14 = vrot.slane %v2195_v13, 4 }
  0x97   :  { %v435_v15 = vsel %vm220_vm3, %v424_v9, %v430_v11  ;;  %v433_v16 = vsel %vm43_vm0, %v429_v12, %v430_v11  ;;  %v1829_v17 = vld [vmem:[#allocation2 + $0xc8] sm:$0xf] }
  0x98   :  { %444 = vst [vmem:[#allocation2 + $0x134] sm:$0xf] %v435_v15  ;;  %v434_v19 = vsel %vm220_vm3, %v422_v10, %v433_v16  ;;  %v2201_v20 = vor.u32 %v2001_v18, %v1829_v17  ;;  %v2000_v21 = vld [vmem:[#allocation2 + $0xd4] sm:$0xf0]  ;;  %v1823_v22 = vld [vmem:[#allocation2 + $0xd8] sm:$0xf0]  ;;  %v404_v23 = vsel %vm185_vm1, %v2195_v13, %v398_v14 }
  0x99   :  { %443 = vst [vmem:[#allocation2 + $0x12c] sm:$0xff] %v434_v19  ;;  %v1821_v24 = vld [vmem:[#allocation2 + $0xc0] sm:$0xf]  ;;  %v1997_v25 = vld [vmem:[#allocation2 + $0xc4] sm:$0xf] }
  0x9a   :  { %744 = vmatpush.bf16.msra.mxu2 %v2201_v20  ;;  %v2206_v26 = vor.u32 %v2000_v21, %v1821_v24  ;;  %v2208_v28 = vor.u32 %v1997_v25, %v1823_v22  ;;  %412 = vst [vmem:[#allocation2 + $0x11c] sm:$0xf] %v404_v23  ;;  %v16_v21 = vld [vmem:[%s3189_s0 + $0x8] sm:$0xf] }
  0x9b   :  { %20 = vst [vmem:[#allocation2 + $0x8] sm:$0xf] %v16_v21 }
  0x9c   :  { %716 = vmatpush.bf16.msra.mxu0 %v2206_v26  ;;  %730 = vmatpush.bf16.msra.mxu1 %v2208_v28  ;;  %v428_v29 = vpop.permute.xlu0 %427  ;;  %v103_v30 = vpop.permute.xlu1 %102 }
  0x9d   :  { %v432_v32 = vrot.slane %v428_v29, 4  ;;  %v110_v33 = vrot.slane %v103_v30, 4  ;;  %v2213_v34 = vpop.permute.xlu2 %71 }
  0x9f   :  { %v436_v35 = vsel %vm43_vm0, %v431_v31, %v432_v32  ;;  %v438_v36 = vsel %vm220_vm3, %v428_v29, %v432_v32  ;;  %v114_v37 = vsel %vm43_vm0, %v110_v33, %v111_v39 }
  0xa0   :  { %v437_v40 = vsel %vm220_vm3, %v2150_v27, %v436_v35  ;;  %446 = vst [vmem:[#allocation2 + $0x14c] sm:$0xf] %v438_v36  ;;  %v116_v41 = vsel %vm115_vm4, %v103_v30, %v114_v37  ;;  %v2010_v27 = vld [vmem:[#allocation2 + $0x12c] sm:$0xf]  ;;  %v18_v30 = vld [vmem:[%s3189_s0 + $0x1c] sm:$0xf] }
  0xa1   :  { %445 = vst [vmem:[#allocation2 + $0x144] sm:$0xff] %v437_v40  ;;  %v77_v36 = vrot.slane %v2213_v34, 4 }
  0xa2   :  { %125 = vst [vmem:[#allocation2 + $0x90] sm:$0xff] %v116_v41 }
  0xa3   :  { %22 = vst [vmem:[#allocation2 + $0x20] sm:$0xf] %v18_v30 }
  0xa4   :  { %v107_v42 = vpop.permute.xlu0 %106  ;;  %v109_v43 = vpop.permute.xlu1 %108 }
  0xa5   :  { %v112_v44 = vrot.slane %v107_v42, 4  ;;  %v113_v45 = vrot.slane %v109_v43, 4  ;;  %v2223_v46 = vpop.permute.xlu2 %355 }
  0xa6   :  { %v362_v47 = vrot.slane %v2223_v46, 4 }
  0xa7   :  { %v118_v38 = vsel %vm43_vm0, %v112_v44, %v113_v45  ;;  %v120_v39 = vsel %vm115_vm4, %v109_v43, %v113_v45 }
  0xa8   :  { %v119_v48 = vsel %vm115_vm4, %v107_v42, %v118_v38  ;;  %128 = vst [vmem:[#allocation2 + $0xb0] sm:$0xf] %v120_v39  ;;  %v1879_v49 = vld [vmem:[#allocation2 + $0x140] sm:$0xf0]  ;;  %v367_v53 = vsel %vm150_vm2, %v2223_v46, %v362_v47 }
  0xa9   :  { %127 = vst [vmem:[#allocation2 + $0xa8] sm:$0xff] %v119_v48  ;;  %v2233_v54 = vor.u32 %v2010_v27, %v1879_v49  ;;  %v1797_v3 = vld [vmem:[#allocation2 + $0x90] sm:$0xf]  ;;  %v1991_v5 = vld [vmem:[#allocation2 + $0x94] sm:$0xf] }
  0xaa   :  { %376 = vst [vmem:[#allocation2 + $0xd4] sm:$0xf] %v367_v53 }
  0xab   :  { %756 = vmatpush.bf16.msra.mxu3 %v2233_v54 }
  0xac   :  { %v390_v55 = vpop.permute.xlu0 %389  ;;  %v392_v56 = vpop.permute.xlu1 %391 }
  0xad   :  { %v396_v59 = vrot.slane %v390_v55, 4  ;;  %v397_v60 = vrot.slane %v392_v56, 4  ;;  %v2237_v61 = vpop.permute.xlu2 %31 }
  0xaf   :  { %v399_v63 = vsel %vm43_vm0, %v395_v57, %v396_v59  ;;  %v401_v0 = vsel %vm185_vm1, %v390_v55, %v396_v59  ;;  %v402_v1 = vsel %vm43_vm0, %v397_v60, %v398_v14  ;;  %v1995_v2 = vld [vmem:[#allocation2 + $0xac] sm:$0xf0] }
  0xb0   :  { %v400_v6 = vsel %vm185_vm1, %v2178_v58, %v399_v63  ;;  %410 = vst [vmem:[#allocation2 + $0x104] sm:$0xf] %v401_v0  ;;  %v403_v9 = vsel %vm185_vm1, %v392_v56, %v402_v1  ;;  %v2245_v10 = vor.u32 %v1995_v2, %v1805_v62  ;;  %v1994_v11 = vld [vmem:[#allocation2 + $0xa4] sm:$0xf0]  ;;  %v1799_v12 = vld [vmem:[#allocation2 + $0xa8] sm:$0xf0] }
  0xb1   :  { %409 = vst [vmem:[#allocation2 + $0xfc] sm:$0xff] %v400_v6  ;;  %v2247_v13 = vor.u32 %v1994_v11, %v1797_v3  ;;  %v2249_v15 = vor.u32 %v1991_v5, %v1799_v12 }
  0xb2   :  { %411 = vst [vmem:[#allocation2 + $0x114] sm:$0xff] %v403_v9  ;;  %745 = vmatpush.bf16.msra.mxu2 %v2245_v10  ;;  %v39_v9 = vrot.slane %v2237_v61, 4 }
  0xb3   :  { %717 = vmatpush.bf16.msra.mxu0 %v2247_v13  ;;  %731 = vmatpush.bf16.msra.mxu1 %v2249_v15 }
  0xb4   :  { %v70_v58 = vpop.permute.xlu1 %69  ;;  %v68_v14 = vpop.permute.xlu0 %67 }
  0xb5   :  { %v76_v16 = vrot.slane %v70_v58, 4  ;;  %v75_v17 = vrot.slane %v68_v14, 4  ;;  %v2254_v18 = vpop.permute.xlu2 %37 }
  0xb6   :  { %v42_v19 = vrot.slane %v2254_v18, 4 }
  0xb7   :  { %v82_v22 = vsel %vm80_vm5, %v70_v58, %v76_v16  ;;  %v79_v23 = vsel %vm43_vm0, %v75_v17, %v76_v16 }
  0xb8   :  { %91 = vst [vmem:[#allocation2 + $0x68] sm:$0xf] %v82_v22  ;;  %v81_v24 = vsel %vm80_vm5, %v68_v14, %v79_v23  ;;  %v2004_v25 = vld [vmem:[#allocation2 + $0xfc] sm:$0xf]  ;;  %v50_v29 = vsel %vm45_vm6, %v2254_v18, %v42_v19 }
  0xb9   :  { %90 = vst [vmem:[#allocation2 + $0x60] sm:$0xff] %v81_v24  ;;  %v1855_v31 = vld [vmem:[#allocation2 + $0x110] sm:$0xf0] }
  0xba   :  { %v2268_v32 = vor.u32 %v2004_v25, %v1855_v31  ;;  %58 = vst [vmem:[#allocation2 + $0x50] sm:$0xf] %v50_v29 }
  0xbc   :  { %757 = vmatpush.bf16.msra.mxu3 %v2268_v32  ;;  %v354_v33 = vpop.permute.xlu1 %353  ;;  %v74_v35 = vpop.permute.xlu0 %73 }
  0xbd   :  { %v361_v37 = vrot.slane %v354_v33, 4  ;;  %v78_v40 = vrot.slane %v74_v35, 4  ;;  %v2272_v41 = vpop.permute.xlu2 %323 }
  0xbf   :  { %v365_v42 = vsel %vm43_vm0, %v361_v37, %v362_v47  ;;  %v83_v43 = vsel %vm43_vm0, %v77_v36, %v78_v40  ;;  %v85_v44 = vsel %vm80_vm5, %v74_v35, %v78_v40  ;;  %v1781_v56 = vld [vmem:[#allocation2 + $0x68] sm:$0xf]  ;;  %v1977_v36 = vld [vmem:[#allocation2 + $0x1c] sm:$0xf0]  ;;  %v1690_v37 = vld [vmem:[%s3189_s0 + $0x30] sm:$0xf] }
  0xc0   :  { %v366_v45 = vsel %vm150_vm2, %v354_v33, %v365_v42  ;;  %v84_v38 = vsel %vm80_vm5, %v2213_v34, %v83_v43  ;;  %93 = vst [vmem:[#allocation2 + $0x80] sm:$0xf] %v85_v44  ;;  %v1773_v60 = vld [vmem:[#allocation2 + $0x60] sm:$0xf]  ;;  %v1985_v62 = vld [vmem:[#allocation2 + $0x64] sm:$0xf] }
  0xc1   :  { %375 = vst [vmem:[#allocation2 + $0xcc] sm:$0xff] %v366_v45  ;;  %v1983_v31 = vld [vmem:[#allocation2 + $0x4c] sm:$0xf0]  ;;  %v1733_v33 = vld [vmem:[#allocation2 + $0x8] sm:$0xf] }
  0xc2   :  { %92 = vst [vmem:[#allocation2 + $0x78] sm:$0xff] %v84_v38  ;;  %v1725_v44 = vld [vmem:[#allocation2] sm:$0xf]  ;;  %v1976_v45 = vld [vmem:[#allocation2 + $0x14] sm:$0xf0] }
  0xc3   :  { %v1973_v38 = vld [vmem:[#allocation2 + $0x4] sm:$0xf]  ;;  %240 = vst [vmem:[#allocation2 + $0x14] sm:$0xf] %v1690_v37 }
  0xc4   :  { %v360_v39 = vpop.permute.xlu1 %359  ;;  %v358_v48 = vpop.permute.xlu0 %357 }
  0xc5   :  { %v364_v27 = vrot.slane %v360_v39, 4  ;;  %v363_v49 = vrot.slane %v358_v48, 4  ;;  %v2282_v53 = vpop.permute.xlu2 %287 }
  0xc6   :  { %v294_v46 = vrot.slane %v2282_v53, 4 }
  0xc7   :  { %v370_v47 = vsel %vm150_vm2, %v360_v39, %v364_v27  ;;  %v368_v55 = vsel %vm43_vm0, %v363_v49, %v364_v27  ;;  %v1989_v57 = vld [vmem:[#allocation2 + $0x7c] sm:$0xf0]  ;;  %v1727_v39 = vld [vmem:[#allocation2 + $0x18] sm:$0xf0] }
  0xc8   :  { %378 = vst [vmem:[#allocation2 + $0xec] sm:$0xf] %v370_v47  ;;  %v369_v34 = vsel %vm150_vm2, %v358_v48, %v368_v55  ;;  %v2288_v59 = vor.u32 %v1989_v57, %v1781_v56  ;;  %v299_v63 = vsel %vm80_vm5, %v2282_v53, %v294_v46  ;;  %v1998_v22 = vld [vmem:[#allocation2 + $0xcc] sm:$0xf]  ;;  %v1692_v48 = vld [vmem:[%s3189_s0 + $0x44] sm:$0xf] }
  0xc9   :  { %377 = vst [vmem:[#allocation2 + $0xe4] sm:$0xff] %v369_v34  ;;  %v1988_v0 = vld [vmem:[#allocation2 + $0x74] sm:$0xf0]  ;;  %v1775_v1 = vld [vmem:[#allocation2 + $0x78] sm:$0xf0] }
  0xca   :  { %746 = vmatpush.bf16.msra.mxu2 %v2288_v59  ;;  %v2295_v2 = vor.u32 %v1988_v0, %v1773_v60  ;;  %v2297_v3 = vor.u32 %v1985_v62, %v1775_v1  ;;  %308 = vst [vmem:[#allocation2 + $0x74] sm:$0xf] %v299_v63  ;;  %v2336_v63 = vor.u32 %v1977_v36, %v1733_v33  ;;  %v2014_v0 = vld [vmem:[#allocation2 + $0x144] sm:$0xf0]  ;;  %v1887_v1 = vld [vmem:[#allocation2 + $0x148] sm:$0xf0] }
  0xcb   :  { %242 = vst [vmem:[#allocation2 + $0x2c] sm:$0xf] %v1692_v48  ;;  %v1861_v53 = vld [vmem:[#allocation2 + $0x100] sm:$0xf]  ;;  %v1863_v36 = vld [vmem:[#allocation2 + $0x118] sm:$0xf0] }
  0xcc   :  { %718 = vmatpush.bf16.msra.mxu0 %v2295_v2  ;;  %732 = vmatpush.bf16.msra.mxu1 %v2297_v3  ;;  %v36_v5 = vpop.permute.xlu1 %35  ;;  %v34_v6 = vpop.permute.xlu0 %33  ;;  %v1999_v48 = vld [vmem:[#allocation2 + $0xd4] sm:$0xf] }
  0xcd   :  { %v41_v11 = vrot.slane %v36_v5, 4  ;;  %v40_v12 = vrot.slane %v34_v6, 4  ;;  %v2302_v58 = vpop.permute.xlu2 %251 }
  0xcf   :  { %v48_v14 = vsel %vm43_vm0, %v41_v11, %v42_v19  ;;  %v44_v16 = vsel %vm43_vm0, %v39_v9, %v40_v12  ;;  %v47_v17 = vsel %vm45_vm6, %v34_v6, %v40_v12  ;;  %v2340_v9 = vor.u32 %v1976_v45, %v1725_v44  ;;  %v2011_v12 = vld [vmem:[#allocation2 + $0x134] sm:$0xf]  ;;  %v1839_v44 = vld [vmem:[#allocation2 + $0xe8] sm:$0xf0] }
  0xd0   :  { %v49_v18 = vsel %vm45_vm6, %v36_v5, %v48_v14  ;;  %v46_v21 = vsel %vm45_vm6, %v2237_v61, %v44_v16  ;;  %56 = vst [vmem:[#allocation2 + $0x38] sm:$0xf] %v47_v17  ;;  %v1831_v23 = vld [vmem:[#allocation2 + $0xe0] sm:$0xf0]  ;;  %v2342_v11 = vor.u32 %v1973_v38, %v1727_v39  ;;  %v329_v14 = vrot.slane %v2272_v41, 4 }
  0xd1   :  { %57 = vst [vmem:[#allocation2 + $0x48] sm:$0xff] %v49_v18  ;;  %v2310_v24 = vor.u32 %v1998_v22, %v1831_v23  ;;  %v1885_v18 = vld [vmem:[#allocation2 + $0x130] sm:$0xf]  ;;  %v2348_v22 = vor.u32 %v2011_v12, %v1887_v1  ;;  %v2353_v23 = vld [vmem:[%s3190_s1 + $0x8] sm:$0xff] }
  0xd2   :  { %55 = vst [vmem:[#allocation2 + $0x30] sm:$0xff] %v46_v21  ;;  %v2346_v21 = vor.u32 %v2014_v0, %v1885_v18  ;;  %v1837_v39 = vld [vmem:[#allocation2 + $0xd0] sm:$0xf] }
  0xd3   :  { %758 = vmatpush.bf16.msra.mxu3 %v2310_v24 }
  0xd4   :  { %v322_v25 = vpop.permute.xlu1 %321  ;;  %v320_v19 = vpop.permute.xlu0 %319 }
  0xd5   :  { %v328_v29 = vrot.slane %v322_v25, 4  ;;  %v327_v30 = vrot.slane %v320_v19, 4  ;;  %v2313_v35 = vpop.permute.xlu2 %257 }
  0xd6   :  { %v262_v61 = vrot.slane %v2313_v35, 4 }
  0xd7   :  { %v333_v40 = vsel %vm115_vm4, %v322_v25, %v328_v29  ;;  %v331_v42 = vsel %vm43_vm0, %v327_v30, %v328_v29  ;;  %v1757_v43 = vld [vmem:[#allocation2 + $0x38] sm:$0xf]  ;;  %v2005_v30 = vld [vmem:[#allocation2 + $0x104] sm:$0xf] }
  0xd8   :  { %342 = vst [vmem:[#allocation2 + $0xa4] sm:$0xf] %v333_v40  ;;  %v332_v27 = vsel %vm115_vm4, %v320_v19, %v331_v42  ;;  %v2325_v49 = vor.u32 %v1983_v31, %v1757_v43  ;;  %v1982_v47 = vld [vmem:[#allocation2 + $0x44] sm:$0xf0]  ;;  %v1751_v55 = vld [vmem:[#allocation2 + $0x48] sm:$0xf0]  ;;  %v268_v56 = vsel %vm45_vm6, %v2313_v35, %v262_v61  ;;  %v2375_v37 = vor.u32 %v2005_v30, %v1863_v36 }
  0xd9   :  { %341 = vst [vmem:[#allocation2 + $0x9c] sm:$0xff] %v332_v27  ;;  %v1749_v57 = vld [vmem:[#allocation2 + $0x30] sm:$0xf]  ;;  %v1979_v34 = vld [vmem:[#allocation2 + $0x34] sm:$0xf] }
  0xda   :  { %747 = vmatpush.bf16.msra.mxu2 %v2325_v49  ;;  %v2332_v60 = vor.u32 %v1982_v47, %v1749_v57  ;;  %v2334_v62 = vor.u32 %v1979_v34, %v1751_v55  ;;  %276 = vst [vmem:[#allocation2 + $0x5c] sm:$0xf] %v268_v56  ;;  %v2002_v43 = vld [vmem:[#allocation2 + $0xe4] sm:$0xf0]  ;;  %v2386_v56 = vor.u32 %v1999_v48, %v1839_v44  ;;  %v1975_v48 = vld [vmem:[#allocation2 + $0x14] sm:$0xf] }
  0xdb   :  { %v2384_v55 = vor.u32 %v2002_v43, %v1837_v39 }
  0xdc   :  { %719 = vmatpush.bf16.msra.mxu0 %v2332_v60  ;;  %733 = vmatpush.bf16.msra.mxu1 %v2334_v62  ;;  %v286_v5 = vpop.permute.xlu1 %285  ;;  %v326_v6 = vpop.permute.xlu0 %325 }
  0xdd   :  { %v293_v16 = vrot.slane %v286_v5, 4  ;;  %v330_v17 = vrot.slane %v326_v6, 4 }
  0xde   :  { %748 = vmatpush.bf16.msra.mxu2 %v2336_v63 }
  0xdf   :  { %v297_v25 = vsel %vm43_vm0, %v293_v16, %v294_v46  ;;  %v334_v19 = vsel %vm43_vm0, %v329_v14, %v330_v17  ;;  %v336_v29 = vsel %vm115_vm4, %v326_v6, %v330_v17  ;;  %v2008_v46 = vld [vmem:[#allocation2 + $0x114] sm:$0xf0]  ;;  %v1993_v16 = vld [vmem:[#allocation2 + $0xa4] sm:$0xf] }
  0xe0   :  { %v298_v31 = vsel %vm80_vm5, %v286_v5, %v297_v25  ;;  %v335_v33 = vsel %vm115_vm4, %v2272_v41, %v334_v19  ;;  %344 = vst [vmem:[#allocation2 + $0xbc] sm:$0xf] %v336_v29  ;;  %720 = vmatpush.bf16.msra.mxu0 %v2340_v9  ;;  %734 = vmatpush.bf16.msra.mxu1 %v2342_v11  ;;  %v1992_v57 = vld [vmem:[#allocation2 + $0x9c] sm:$0xf]  ;;  %v1813_v0 = vld [vmem:[#allocation2 + $0xa0] sm:$0xf] }
  0xe1   :  { %307 = vst [vmem:[#allocation2 + $0x6c] sm:$0xff] %v298_v31  ;;  %1893 = vmatmul.msk.bf16.vlgmr.msra.gmra.mxu2 %vm709_vm7, %v2353_v23  ;;  %v2373_v41 = vor.u32 %v2008_v46, %v1861_v53  ;;  %v259_v19 = vrot.slane %v2302_v58, 4  ;;  %v1987_v31 = vld [vmem:[#allocation2 + $0x74] sm:$0xf] }
  0xe2   :  { %845 = vmatpush.bf16.msrb.mxu2 %v2168_v50  ;;  %343 = vst [vmem:[#allocation2 + $0xb4] sm:$0xff] %v335_v33 }
  0xe3   :  { %1891 = vmatmul.msk.bf16.vlgmr.msra.gmra.mxu0 %vm709_vm7, %v2353_v23  ;;  %1892 = vmatmul.msk.bf16.vlgmr.msra.gmra.mxu1 %vm709_vm7, %v2353_v23 }
  0xe4   :  { %770 = vmatpush.bf16.msrb.mxu0 %v2346_v21  ;;  %784 = vmatpush.bf16.msrb.mxu1 %v2348_v22  ;;  %v292_v40 = vpop.permute.xlu1 %291  ;;  %v290_v42 = vpop.permute.xlu0 %289 }
  0xe5   :  { %v296_v45 = vrot.slane %v292_v40, 4  ;;  %v295_v38 = vrot.slane %v290_v42, 4 }
  0xe6   :  { %846 = vmatpush.bf16.msrb.mxu2 %v2188_v7 }
  0xe7   :  { %v302_v27 = vsel %vm80_vm5, %v292_v40, %v296_v45  ;;  %v300_v47 = vsel %vm43_vm0, %v295_v38, %v296_v45  ;;  %v1815_v1 = vld [vmem:[#allocation2 + $0xb8] sm:$0xf0] }
  0xe8   :  { %771 = vmatpush.bf16.msrb.mxu0 %v2373_v41  ;;  %785 = vmatpush.bf16.msrb.mxu1 %v2375_v37  ;;  %310 = vst [vmem:[#allocation2 + $0x8c] sm:$0xf] %v302_v27  ;;  %v301_v34 = vsel %vm80_vm5, %v290_v42, %v300_v47  ;;  %v2396_v17 = vor.u32 %v1993_v16, %v1815_v1  ;;  %v1986_v40 = vld [vmem:[#allocation2 + $0x6c] sm:$0xf]  ;;  %v1789_v42 = vld [vmem:[#allocation2 + $0x70] sm:$0xf] }
  0xe9   :  { %309 = vst [vmem:[#allocation2 + $0x84] sm:$0xff] %v301_v34  ;;  %v1807_v5 = vld [vmem:[#allocation2 + $0xb0] sm:$0xf0]  ;;  %v1996_v6 = vld [vmem:[#allocation2 + $0xb4] sm:$0xf0] }
  0xea   :  { %847 = vmatpush.bf16.msrb.mxu2 %v2206_v26  ;;  %v2391_v12 = vor.u32 %v1992_v57, %v1807_v5  ;;  %v2393_v14 = vor.u32 %v1996_v6, %v1813_v0  ;;  %v1743_v47 = vld [vmem:[#allocation2 + $0x28] sm:$0xf0]  ;;  %v1735_v34 = vld [vmem:[#allocation2 + $0x20] sm:$0xf0]  ;;  %v1741_v16 = vld [vmem:[#allocation2 + $0x10] sm:$0xf] }
  0xeb   :  { %v1974_v57 = vld [vmem:[#allocation2 + $0xc] sm:$0xf]  ;;  %v2424_v0 = vld [vmem:[%s3190_s1] sm:$0xff] }
  0xec   :  { %772 = vmatpush.bf16.msrb.mxu0 %v2384_v55  ;;  %786 = vmatpush.bf16.msrb.mxu1 %v2386_v56  ;;  %v256_v18 = vpop.permute.xlu1 %255  ;;  %v254_v25 = vpop.permute.xlu0 %253 }
  0xed   :  { %759 = vmatpush.bf16.msra.mxu3 %v2391_v12  ;;  %v261_v29 = vrot.slane %v256_v18, 4  ;;  %v260_v30 = vrot.slane %v254_v25, 4 }
  0xee   :  { %848 = vmatpush.bf16.msrb.mxu2 %v2247_v13 }
  0xef   :  { %v266_v33 = vsel %vm43_vm0, %v261_v29, %v262_v61  ;;  %v263_v53 = vsel %vm43_vm0, %v259_v19, %v260_v30  ;;  %v265_v46 = vsel %vm45_vm6, %v254_v25, %v260_v30  ;;  %v1791_v36 = vld [vmem:[#allocation2 + $0x88] sm:$0xf0]  ;;  %v1978_v19 = vld [vmem:[#allocation2 + $0x24] sm:$0xf0] }
  0xf0   :  { %773 = vmatpush.bf16.msrb.mxu0 %v2393_v14  ;;  %787 = vmatpush.bf16.msrb.mxu1 %v2396_v17  ;;  %v267_v43 = vsel %vm45_vm6, %v256_v18, %v266_v33  ;;  %v264_v44 = vsel %vm45_vm6, %v2302_v58, %v263_v53  ;;  %274 = vst [vmem:[#allocation2 + $0x44] sm:$0xf] %v265_v46  ;;  %v1783_v35 = vld [vmem:[#allocation2 + $0x80] sm:$0xf0]  ;;  %v1990_v38 = vld [vmem:[#allocation2 + $0x84] sm:$0xf0] }
  0xf1   :  { %v2411_v45 = vor.u32 %v1987_v31, %v1791_v36  ;;  %275 = vst [vmem:[#allocation2 + $0x54] sm:$0xff] %v267_v43  ;;  %v2413_v61 = vor.u32 %v1986_v40, %v1783_v35  ;;  %v2415_v39 = vor.u32 %v1990_v38, %v1789_v42  ;;  %v1767_v58 = vld [vmem:[#allocation2 + $0x58] sm:$0xf0]  ;;  %v2435_v31 = vor.u32 %v1975_v48, %v1743_v47  ;;  %v2630_v38 = vld [vmem:[%s3190_s1 + $0x20] sm:$0xff] }
  0xf2   :  { %849 = vmatpush.bf16.msrb.mxu2 %v2295_v2  ;;  %273 = vst [vmem:[#allocation2 + $0x3c] sm:$0xff] %v264_v44  ;;  %v2441_v33 = vor.u32 %v1974_v57, %v1735_v34  ;;  %v2443_v53 = vor.u32 %v1978_v19, %v1741_v16  ;;  %v2550_v46 = vld [vmem:[%s3190_s1 + $0x18] sm:$0xff] }
  0xf3   :  { %760 = vmatpush.bf16.msra.mxu3 %v2413_v61 }
  0xf4   :  { %788 = vmatpush.bf16.msrb.mxu1 %v2411_v45  ;;  %774 = vmatpush.bf16.msrb.mxu0 %v2415_v39 }
  0xf6   :  { %850 = vmatpush.bf16.msrb.mxu2 %v2332_v60 }
  0xf7   :  { %v1981_v27 = vld [vmem:[#allocation2 + $0x44] sm:$0xf] }
  0xf8   :  { %v2427_v1 = vor.u32 %v1981_v27, %v1767_v58  ;;  %v1759_v5 = vld [vmem:[#allocation2 + $0x50] sm:$0xf0]  ;;  %v1984_v6 = vld [vmem:[#allocation2 + $0x54] sm:$0xf0] }
  0xf9   :  { %v1980_v18 = vld [vmem:[#allocation2 + $0x3c] sm:$0xf]  ;;  %v1765_v25 = vld [vmem:[#allocation2 + $0x40] sm:$0xf] }
  0xfa   :  { %851 = vmatpush.bf16.msrb.mxu2 %v2340_v9  ;;  %789 = vmatpush.bf16.msrb.mxu1 %v2427_v1  ;;  %v2431_v29 = vor.u32 %v1980_v18, %v1759_v5  ;;  %v2433_v30 = vor.u32 %v1984_v6, %v1765_v25 }
  0xfc   :  { %761 = vmatpush.bf16.msra.mxu3 %v2431_v29  ;;  %775 = vmatpush.bf16.msrb.mxu0 %v2433_v30 }
  0xfd   :  { %1901 = vmatmul.msk.bf16.vlgmr.msrb.gmra.mxu2 %vm709_vm7, %v2424_v0 }
  0xfe   :  { %901 = vmatpush.bf16.msra.mxu2 %v2346_v21  ;;  %790 = vmatpush.bf16.msrb.mxu1 %v2435_v31 }
 0x100   :  { %762 = vmatpush.bf16.msra.mxu3 %v2441_v33  ;;  %776 = vmatpush.bf16.msrb.mxu0 %v2443_v53 }
 0x101   :  { %1896 = vmatmul.msk.bf16.vlgmr.msrb.gmra.mxu1 %vm709_vm7, %v2353_v23 }
 0x102   :  { %902 = vmatpush.bf16.msra.mxu2 %v2373_v41  ;;  %887 = vmatpush.bf16.msra.mxu1 %v2233_v54 }
 0x103   :  { %1894 = vmatmul.msk.bf16.vlgmr.msra.gmra.mxu3 %vm709_vm7, %v2353_v23  ;;  %1895 = vmatmul.msk.bf16.vlgmr.msrb.gmra.mxu0 %vm709_vm7, %v2353_v23  ;;  %v2017_v23 = vld [vmem:[%s3190_s1 + $0x10] sm:$0xff] }
 0x104   :  { %859 = vmatpush.bf16.msrb.mxu3 %v2170_v51  ;;  %873 = vmatpush.bf16.msra.mxu0 %v2172_v52 }
 0x106   :  { %903 = vmatpush.bf16.msra.mxu2 %v2384_v55  ;;  %888 = vmatpush.bf16.msra.mxu1 %v2268_v32 }
 0x108   :  { %860 = vmatpush.bf16.msrb.mxu3 %v2190_v8  ;;  %874 = vmatpush.bf16.msra.mxu0 %v2186_v4 }
 0x10a   :  { %904 = vmatpush.bf16.msra.mxu2 %v2393_v14  ;;  %889 = vmatpush.bf16.msra.mxu1 %v2310_v24 }
 0x10c   :  { %861 = vmatpush.bf16.msrb.mxu3 %v2208_v28  ;;  %875 = vmatpush.bf16.msra.mxu0 %v2201_v20 }
 0x10e   :  { %905 = vmatpush.bf16.msra.mxu2 %v2415_v39  ;;  %890 = vmatpush.bf16.msra.mxu1 %v2391_v12 }
 0x110   :  { %862 = vmatpush.bf16.msrb.mxu3 %v2249_v15  ;;  %876 = vmatpush.bf16.msra.mxu0 %v2245_v10 }
 0x112   :  { %906 = vmatpush.bf16.msra.mxu2 %v2433_v30  ;;  %891 = vmatpush.bf16.msra.mxu1 %v2413_v61 }
 0x114   :  { %863 = vmatpush.bf16.msrb.mxu3 %v2297_v3  ;;  %877 = vmatpush.bf16.msra.mxu0 %v2288_v59 }
 0x116   :  { %907 = vmatpush.bf16.msra.mxu2 %v2443_v53  ;;  %892 = vmatpush.bf16.msra.mxu1 %v2431_v29 }
 0x118   :  { %864 = vmatpush.bf16.msrb.mxu3 %v2334_v62  ;;  %878 = vmatpush.bf16.msra.mxu0 %v2325_v49 }
 0x119   :  { %1905 = vmatmul.msk.bf16.vlgmr.msra.gmra.mxu2 %vm709_vm7, %v2424_v0 }
 0x11a   :  { %968 = vmatpush.bf16.msrb.mxu2 %v2172_v52  ;;  %893 = vmatpush.bf16.msra.mxu1 %v2441_v33 }
 0x11c   :  { %865 = vmatpush.bf16.msrb.mxu3 %v2342_v11  ;;  %879 = vmatpush.bf16.msra.mxu0 %v2336_v63 }
 0x11d   :  { %1904 = vmatmul.msk.bf16.vlgmr.msra.gmra.mxu1 %vm709_vm7, %v2424_v0 }
 0x11e   :  { %969 = vmatpush.bf16.msrb.mxu2 %v2186_v4  ;;  %954 = vmatpush.bf16.msrb.mxu1 %v2170_v51 }
 0x11f   :  { %1903 = vmatmul.msk.bf16.vlgmr.msra.gmra.mxu0 %vm709_vm7, %v2424_v0  ;;  %1902 = vmatmul.msk.bf16.vlgmr.msrb.gmra.mxu3 %vm709_vm7, %v2424_v0 }
 0x120   :  { %915 = vmatpush.bf16.msra.mxu3 %v2348_v22  ;;  %940 = vmatpush.bf16.msrb.mxu0 %v2168_v50 }
 0x122   :  { %970 = vmatpush.bf16.msrb.mxu2 %v2201_v20  ;;  %955 = vmatpush.bf16.msrb.mxu1 %v2190_v8 }
 0x124   :  { %916 = vmatpush.bf16.msra.mxu3 %v2375_v37  ;;  %941 = vmatpush.bf16.msrb.mxu0 %v2188_v7 }
 0x126   :  { %971 = vmatpush.bf16.msrb.mxu2 %v2245_v10  ;;  %956 = vmatpush.bf16.msrb.mxu1 %v2208_v28 }
 0x128   :  { %917 = vmatpush.bf16.msra.mxu3 %v2386_v56  ;;  %942 = vmatpush.bf16.msrb.mxu0 %v2206_v26 }
 0x12a   :  { %972 = vmatpush.bf16.msrb.mxu2 %v2288_v59  ;;  %957 = vmatpush.bf16.msrb.mxu1 %v2249_v15 }
 0x12c   :  { %918 = vmatpush.bf16.msra.mxu3 %v2396_v17  ;;  %943 = vmatpush.bf16.msrb.mxu0 %v2247_v13 }
 0x12e   :  { %973 = vmatpush.bf16.msrb.mxu2 %v2325_v49  ;;  %958 = vmatpush.bf16.msrb.mxu1 %v2297_v3 }
 0x130   :  { %919 = vmatpush.bf16.msra.mxu3 %v2411_v45  ;;  %944 = vmatpush.bf16.msrb.mxu0 %v2295_v2 }
 0x132   :  { %974 = vmatpush.bf16.msrb.mxu2 %v2336_v63  ;;  %959 = vmatpush.bf16.msrb.mxu1 %v2334_v62 }
 0x134   :  { %920 = vmatpush.bf16.msra.mxu3 %v2427_v1  ;;  %945 = vmatpush.bf16.msrb.mxu0 %v2332_v60 }
 0x135   :  { %1915 = vmatmul.msk.bf16.vlgmr.msrb.gmra.mxu2 %vm709_vm7, %v2017_v23 }
 0x136   :  { %1084 = vmatpush.bf16.msra.mxu2 %v2168_v50  ;;  %960 = vmatpush.bf16.msrb.mxu1 %v2342_v11 }
 0x138   :  { %921 = vmatpush.bf16.msra.mxu3 %v2435_v31  ;;  %946 = vmatpush.bf16.msrb.mxu0 %v2340_v9 }
 0x139   :  { %1914 = vmatmul.msk.bf16.vlgmr.msrb.gmra.mxu1 %vm709_vm7, %v2017_v23 }
 0x13a   :  { %1085 = vmatpush.bf16.msra.mxu2 %v2188_v7  ;;  %1010 = vmatpush.bf16.msra.mxu1 %v2348_v22 }
 0x13b   :  { %1913 = vmatmul.msk.bf16.vlgmr.msrb.gmra.mxu0 %vm709_vm7, %v2017_v23  ;;  %1906 = vmatmul.msk.bf16.vlgmr.msra.gmra.mxu3 %vm709_vm7, %v2424_v0  ;;  %v2677_v0 = vld [vmem:[%s3190_s1 + $0x28] sm:$0xff] }
 0x13c   :  { %982 = vmatpush.bf16.msrb.mxu3 %v2233_v54  ;;  %996 = vmatpush.bf16.msra.mxu0 %v2346_v21 }
 0x13e   :  { %1086 = vmatpush.bf16.msra.mxu2 %v2206_v26  ;;  %1011 = vmatpush.bf16.msra.mxu1 %v2375_v37 }
 0x140   :  { %983 = vmatpush.bf16.msrb.mxu3 %v2268_v32  ;;  %997 = vmatpush.bf16.msra.mxu0 %v2373_v41 }
 0x142   :  { %1087 = vmatpush.bf16.msra.mxu2 %v2247_v13  ;;  %1012 = vmatpush.bf16.msra.mxu1 %v2386_v56 }
 0x144   :  { %984 = vmatpush.bf16.msrb.mxu3 %v2310_v24  ;;  %998 = vmatpush.bf16.msra.mxu0 %v2384_v55 }
 0x146   :  { %1088 = vmatpush.bf16.msra.mxu2 %v2295_v2  ;;  %1013 = vmatpush.bf16.msra.mxu1 %v2396_v17 }
 0x148   :  { %985 = vmatpush.bf16.msrb.mxu3 %v2391_v12  ;;  %999 = vmatpush.bf16.msra.mxu0 %v2393_v14 }
 0x14a   :  { %1089 = vmatpush.bf16.msra.mxu2 %v2332_v60  ;;  %1014 = vmatpush.bf16.msra.mxu1 %v2411_v45 }
 0x14c   :  { %986 = vmatpush.bf16.msrb.mxu3 %v2413_v61  ;;  %1000 = vmatpush.bf16.msra.mxu0 %v2415_v39 }
 0x14e   :  { %1090 = vmatpush.bf16.msra.mxu2 %v2340_v9  ;;  %1015 = vmatpush.bf16.msra.mxu1 %v2427_v1 }
 0x150   :  { %987 = vmatpush.bf16.msrb.mxu3 %v2431_v29  ;;  %1001 = vmatpush.bf16.msra.mxu0 %v2433_v30 }
 0x151   :  { %1925 = vmatmul.msk.bf16.vlgmr.msra.gmra.mxu2 %vm709_vm7, %v2550_v46 }
 0x152   :  { %1140 = vmatpush.bf16.msrb.mxu2 %v2346_v21  ;;  %1016 = vmatpush.bf16.msra.mxu1 %v2435_v31 }
 0x154   :  { %988 = vmatpush.bf16.msrb.mxu3 %v2441_v33  ;;  %1002 = vmatpush.bf16.msra.mxu0 %v2443_v53 }
 0x155   :  { %1918 = vmatmul.msk.bf16.vlgmr.msra.gmra.mxu1 %vm709_vm7, %v2017_v23 }
 0x156   :  { %1141 = vmatpush.bf16.msrb.mxu2 %v2373_v41  ;;  %1126 = vmatpush.bf16.msrb.mxu1 %v2233_v54 }
 0x157   :  { %1916 = vmatmul.msk.bf16.vlgmr.msrb.gmra.mxu3 %vm709_vm7, %v2017_v23  ;;  %1917 = vmatmul.msk.bf16.vlgmr.msra.gmra.mxu0 %vm709_vm7, %v2017_v23 }
 0x158   :  { %1098 = vmatpush.bf16.msra.mxu3 %v2170_v51  ;;  %1112 = vmatpush.bf16.msrb.mxu0 %v2172_v52 }
 0x15a   :  { %1142 = vmatpush.bf16.msrb.mxu2 %v2384_v55  ;;  %1127 = vmatpush.bf16.msrb.mxu1 %v2268_v32 }
 0x15c   :  { %1099 = vmatpush.bf16.msra.mxu3 %v2190_v8  ;;  %1113 = vmatpush.bf16.msrb.mxu0 %v2186_v4 }
 0x15e   :  { %1143 = vmatpush.bf16.msrb.mxu2 %v2393_v14  ;;  %1128 = vmatpush.bf16.msrb.mxu1 %v2310_v24 }
 0x160   :  { %1100 = vmatpush.bf16.msra.mxu3 %v2208_v28  ;;  %1114 = vmatpush.bf16.msrb.mxu0 %v2201_v20  ;;  %v722_v36 = vpop.f32.mrf.mxu0  ;;  %v736_v40 = vpop.f32.mrf.mxu1 }
 0x161   :  { %797 = vrot.lane.b32.xlu0 %v722_v36, %s2043_s22  ;;  %801 = vrot.lane.b32.xlu2 %v736_v40, %s2043_s22 }
 0x162   :  { %1144 = vmatpush.bf16.msrb.mxu2 %v2415_v39  ;;  %1129 = vmatpush.bf16.msrb.mxu1 %v2391_v12 }
 0x164   :  { %1101 = vmatpush.bf16.msra.mxu3 %v2249_v15  ;;  %1115 = vmatpush.bf16.msrb.mxu0 %v2245_v10  ;;  %v750_v42 = vpop.f32.mrf.mxu2 }
 0x165   :  { %805 = vrot.lane.b32.xlu1 %v750_v42, %s2043_s22 }
 0x166   :  { %1145 = vmatpush.bf16.msrb.mxu2 %v2433_v30  ;;  %1130 = vmatpush.bf16.msrb.mxu1 %v2413_v61 }
 0x168   :  { %1102 = vmatpush.bf16.msra.mxu3 %v2297_v3  ;;  %1116 = vmatpush.bf16.msrb.mxu0 %v2288_v59  ;;  %v724_v44 = vpop.f32.mrf.mxu0  ;;  %v738_v35 = vpop.f32.mrf.mxu1 }
 0x16a   :  { %1146 = vmatpush.bf16.msrb.mxu2 %v2443_v53  ;;  %1131 = vmatpush.bf16.msrb.mxu1 %v2431_v29 }
 0x16c   :  { %1103 = vmatpush.bf16.msra.mxu3 %v2334_v62  ;;  %1117 = vmatpush.bf16.msrb.mxu0 %v2325_v49  ;;  %v752_v43 = vpop.f32.mrf.mxu2 }
 0x16d   :  { %1929 = vmatmul.msk.bf16.vlgmr.msrb.gmra.mxu2 %vm709_vm7, %v2550_v46  ;;  %807 = vrot.lane.b32.xlu2 %v752_v43, %s2043_s22 }
 0x16e   :  { %1256 = vmatpush.bf16.msra.mxu2 %v2172_v52  ;;  %1132 = vmatpush.bf16.msrb.mxu1 %v2441_v33 }
 0x16f   :  { %799 = vrot.lane.b32.xlu1 %v724_v44, %s2043_s22 }
 0x170   :  { %1104 = vmatpush.bf16.msra.mxu3 %v2342_v11  ;;  %1118 = vmatpush.bf16.msrb.mxu0 %v2336_v63 }
 0x171   :  { %1928 = vmatmul.msk.bf16.vlgmr.msrb.gmra.mxu1 %vm709_vm7, %v2550_v46 }
 0x172   :  { %1257 = vmatpush.bf16.msra.mxu2 %v2186_v4  ;;  %1242 = vmatpush.bf16.msra.mxu1 %v2170_v51 }
 0x173   :  { %1926 = vmatmul.msk.bf16.vlgmr.msra.gmra.mxu3 %vm709_vm7, %v2550_v46  ;;  %1927 = vmatmul.msk.bf16.vlgmr.msrb.gmra.mxu0 %vm709_vm7, %v2550_v46 }
 0x174   :  { %1154 = vmatpush.bf16.msrb.mxu3 %v2348_v22  ;;  %1228 = vmatpush.bf16.msra.mxu0 %v2168_v50 }
 0x176   :  { %1258 = vmatpush.bf16.msra.mxu2 %v2201_v20  ;;  %1243 = vmatpush.bf16.msra.mxu1 %v2190_v8 }
 0x178   :  { %1155 = vmatpush.bf16.msrb.mxu3 %v2375_v37  ;;  %1229 = vmatpush.bf16.msra.mxu0 %v2188_v7 }
 0x17a   :  { %1259 = vmatpush.bf16.msra.mxu2 %v2245_v10  ;;  %1244 = vmatpush.bf16.msra.mxu1 %v2208_v28 }
 0x17c   :  { %1156 = vmatpush.bf16.msrb.mxu3 %v2386_v56  ;;  %1230 = vmatpush.bf16.msra.mxu0 %v2206_v26 }
 0x17e   :  { %1260 = vmatpush.bf16.msra.mxu2 %v2288_v59  ;;  %1245 = vmatpush.bf16.msra.mxu1 %v2249_v15  ;;  %v792_v58 = vpop.f32.mrf.mxu1 }
 0x180   :  { %1157 = vmatpush.bf16.msrb.mxu3 %v2396_v17  ;;  %1231 = vmatpush.bf16.msra.mxu0 %v2247_v13  ;;  %v778_v48 = vpop.f32.mrf.mxu0  ;;  %v2661_v57 = vpop.f32.mrf.mxu2 }
 0x181   :  { %813 = vrot.lane.b32.xlu2 %v778_v48, %s2043_s22 }
 0x182   :  { %1261 = vmatpush.bf16.msra.mxu2 %v2325_v49  ;;  %1246 = vmatpush.bf16.msra.mxu1 %v2297_v3 }
 0x184   :  { %1158 = vmatpush.bf16.msrb.mxu3 %v2411_v45  ;;  %1232 = vmatpush.bf16.msra.mxu0 %v2295_v2 }
 0x186   :  { %1262 = vmatpush.bf16.msra.mxu2 %v2336_v63  ;;  %1247 = vmatpush.bf16.msra.mxu1 %v2334_v62  ;;  %v764_v27 = vpop.f32.mrf.mxu3  ;;  %v794_v47 = vpop.f32.mrf.mxu1 }
 0x187   :  { %809 = vrot.lane.b32.xlu0 %v764_v27, %s2043_s22 }
 0x188   :  { %1159 = vmatpush.bf16.msrb.mxu3 %v2427_v1  ;;  %1233 = vmatpush.bf16.msra.mxu0 %v2332_v60  ;;  %v780_v5 = vpop.f32.mrf.mxu0  ;;  %v2681_v6 = vpop.f32.mrf.mxu2 }
 0x189   :  { %1939 = vmatmul.msk.bf16.vlgmr.msra.gmra.mxu2 %vm709_vm7, %v2630_v38  ;;  %819 = vrot.lane.b32.xlu2 %v794_v47, %s2043_s22 }
 0x18a   :  { %1372 = vmatpush.bf16.msrb.mxu2 %v2168_v50  ;;  %1248 = vmatpush.bf16.msra.mxu1 %v2342_v11 }
 0x18c   :  { %1160 = vmatpush.bf16.msrb.mxu3 %v2435_v31  ;;  %1234 = vmatpush.bf16.msra.mxu0 %v2340_v9 }
 0x18d   :  { %1938 = vmatmul.msk.bf16.vlgmr.msra.gmra.mxu1 %vm709_vm7, %v2630_v38 }
 0x18e   :  { %1373 = vmatpush.bf16.msrb.mxu2 %v2188_v7  ;;  %1298 = vmatpush.bf16.msrb.mxu1 %v2348_v22  ;;  %v766_v34 = vpop.f32.mrf.mxu3 }
 0x18f   :  { %1930 = vmatmul.msk.bf16.vlgmr.msrb.gmra.mxu3 %vm709_vm7, %v2550_v46  ;;  %1937 = vmatmul.msk.bf16.vlgmr.msra.gmra.mxu0 %vm709_vm7, %v2630_v38 }
 0x190   :  { %1270 = vmatpush.bf16.msra.mxu3 %v2233_v54  ;;  %1284 = vmatpush.bf16.msrb.mxu0 %v2346_v21 }
 0x191   :  { %811 = vrot.lane.b32.xlu1 %v766_v34, %s2043_s22  ;;  %803 = vrot.lane.b32.xlu0 %v738_v35, %s2043_s22 }
 0x192   :  { %1374 = vmatpush.bf16.msrb.mxu2 %v2206_v26  ;;  %1299 = vmatpush.bf16.msrb.mxu1 %v2375_v37 }
 0x194   :  { %1271 = vmatpush.bf16.msra.mxu3 %v2268_v32  ;;  %1285 = vmatpush.bf16.msrb.mxu0 %v2373_v41 }
 0x196   :  { %1375 = vmatpush.bf16.msrb.mxu2 %v2247_v13  ;;  %1300 = vmatpush.bf16.msrb.mxu1 %v2386_v56 }
 0x198   :  { %1272 = vmatpush.bf16.msra.mxu3 %v2310_v24  ;;  %1286 = vmatpush.bf16.msrb.mxu0 %v2384_v55 }
 0x199   :  { %815 = vrot.lane.b32.xlu0 %v780_v5, %s2043_s22  ;;  %817 = vrot.lane.b32.xlu1 %v792_v58, %s2043_s22 }
 0x19a   :  { %1376 = vmatpush.bf16.msrb.mxu2 %v2295_v2  ;;  %1301 = vmatpush.bf16.msrb.mxu1 %v2396_v17  ;;  %v2715_v25 = vpop.f32.mrf.mxu1 }
 0x19c   :  { %1273 = vmatpush.bf16.msra.mxu3 %v2391_v12  ;;  %1287 = vmatpush.bf16.msrb.mxu0 %v2393_v14  ;;  %v2705_v16 = vpop.f32.mrf.mxu2  ;;  %v2709_v18 = vpop.f32.mrf.mxu0 }
 0x19e   :  { %1377 = vmatpush.bf16.msrb.mxu2 %v2332_v60  ;;  %1302 = vmatpush.bf16.msrb.mxu1 %v2411_v45 }
 0x1a0   :  { %1274 = vmatpush.bf16.msra.mxu3 %v2413_v61  ;;  %1288 = vmatpush.bf16.msrb.mxu0 %v2415_v39 }
 0x1a2   :  { %1378 = vmatpush.bf16.msrb.mxu2 %v2340_v9  ;;  %1303 = vmatpush.bf16.msrb.mxu1 %v2427_v1  ;;  %v2730_v46 = vpop.f32.mrf.mxu3  ;;  %v2732_v36 = vpop.f32.mrf.mxu1 }
 0x1a4   :  { %1275 = vmatpush.bf16.msra.mxu3 %v2431_v29  ;;  %1289 = vmatpush.bf16.msrb.mxu0 %v2433_v30  ;;  %v2721_v19 = vpop.f32.mrf.mxu2  ;;  %v2723_v23 = vpop.f32.mrf.mxu0 }
 0x1a5   :  { %1949 = vmatmul.msk.bf16.vlgmr.msrb.gmra.mxu2 %vm709_vm7, %v2677_v0 }
 0x1a6   :  { %1428 = vmatpush.bf16.msra.mxu2 %v2346_v21  ;;  %1304 = vmatpush.bf16.msrb.mxu1 %v2435_v31 }
 0x1a8   :  { %1276 = vmatpush.bf16.msra.mxu3 %v2441_v33  ;;  %1290 = vmatpush.bf16.msrb.mxu0 %v2443_v53 }
 0x1a9   :  { %1942 = vmatmul.msk.bf16.vlgmr.msrb.gmra.mxu1 %vm709_vm7, %v2630_v38 }
 0x1aa   :  { %1429 = vmatpush.bf16.msra.mxu2 %v2373_v41  ;;  %1414 = vmatpush.bf16.msra.mxu1 %v2233_v54 }
 0x1ab   :  { %1940 = vmatmul.msk.bf16.vlgmr.msra.gmra.mxu3 %vm709_vm7, %v2630_v38  ;;  %1941 = vmatmul.msk.bf16.vlgmr.msrb.gmra.mxu0 %vm709_vm7, %v2630_v38 }
 0x1ac   :  { %1386 = vmatpush.bf16.msrb.mxu3 %v2170_v51  ;;  %1400 = vmatpush.bf16.msra.mxu0 %v2172_v52 }
 0x1ae   :  { %1430 = vmatpush.bf16.msra.mxu2 %v2384_v55  ;;  %1415 = vmatpush.bf16.msra.mxu1 %v2268_v32 }
 0x1b0   :  { %1387 = vmatpush.bf16.msrb.mxu3 %v2190_v8  ;;  %1401 = vmatpush.bf16.msra.mxu0 %v2186_v4 }
 0x1b2   :  { %1431 = vmatpush.bf16.msra.mxu2 %v2393_v14  ;;  %1416 = vmatpush.bf16.msra.mxu1 %v2310_v24 }
 0x1b4   :  { %1388 = vmatpush.bf16.msrb.mxu3 %v2208_v28  ;;  %1402 = vmatpush.bf16.msra.mxu0 %v2201_v20 }
 0x1b6   :  { %1432 = vmatpush.bf16.msra.mxu2 %v2415_v39  ;;  %1417 = vmatpush.bf16.msra.mxu1 %v2391_v12 }
 0x1b8   :  { %1389 = vmatpush.bf16.msrb.mxu3 %v2249_v15  ;;  %1403 = vmatpush.bf16.msra.mxu0 %v2245_v10  ;;  %v948_v40 = vpop.f32.mrf.mxu0 }
 0x1b9   :  { %1023 = vrot.lane.b32.xlu0 %v948_v40, %s2044_s27 }
 0x1ba   :  { %1433 = vmatpush.bf16.msra.mxu2 %v2433_v30  ;;  %1418 = vmatpush.bf16.msra.mxu1 %v2413_v61 }
 0x1bc   :  { %1390 = vmatpush.bf16.msrb.mxu3 %v2297_v3  ;;  %1404 = vmatpush.bf16.msra.mxu0 %v2288_v59 }
 0x1be   :  { %1434 = vmatpush.bf16.msra.mxu2 %v2443_v53  ;;  %1419 = vmatpush.bf16.msra.mxu1 %v2431_v29 }
 0x1c0   :  { %1391 = vmatpush.bf16.msrb.mxu3 %v2334_v62  ;;  %1405 = vmatpush.bf16.msra.mxu0 %v2325_v49 }
 0x1c1   :  { %1953 = vmatmul.msk.bf16.vlgmr.msra.gmra.mxu2 %vm709_vm7, %v2677_v0 }
 0x1c2   :  { %1544 = vmatpush.bf16.msrb.mxu2 %v2172_v52  ;;  %1420 = vmatpush.bf16.msra.mxu1 %v2441_v33  ;;  %v976_v52 = vpop.f32.mrf.mxu2 }
 0x1c3   :  { %1031 = vrot.lane.b32.xlu1 %v976_v52, %s2044_s27 }
 0x1c4   :  { %1392 = vmatpush.bf16.msrb.mxu3 %v2342_v11  ;;  %1406 = vmatpush.bf16.msra.mxu0 %v2336_v63 }
 0x1c5   :  { %1952 = vmatmul.msk.bf16.vlgmr.msra.gmra.mxu1 %vm709_vm7, %v2677_v0 }
 0x1c6   :  { %1545 = vmatpush.bf16.msrb.mxu2 %v2186_v4  ;;  %1530 = vmatpush.bf16.msrb.mxu1 %v2170_v51  ;;  %v2751_v4 = vpop.f32.mrf.mxu3  ;;  %v962_v51 = vpop.f32.mrf.mxu1 }
 0x1c7   :  { %1950 = vmatmul.msk.bf16.vlgmr.msrb.gmra.mxu3 %vm709_vm7, %v2677_v0  ;;  %1951 = vmatmul.msk.bf16.vlgmr.msra.gmra.mxu0 %vm709_vm7, %v2677_v0 }
 0x1c8   :  { %1442 = vmatpush.bf16.msra.mxu3 %v2348_v22  ;;  %1516 = vmatpush.bf16.msrb.mxu0 %v2168_v50  ;;  %v950_v50 = vpop.f32.mrf.mxu0 }
 0x1c9   :  { %1027 = vrot.lane.b32.xlu2 %v962_v51, %s2044_s27 }
 0x1ca   :  { %1546 = vmatpush.bf16.msrb.mxu2 %v2201_v20  ;;  %1531 = vmatpush.bf16.msrb.mxu1 %v2190_v8  ;;  %v2781_v20 = vld [vmem:[%s3190_s1 + $0x30] sm:$0xff]  ;;  %s2045_s1 = smov 125  }
 0x1cb   :  { %1025 = vrot.lane.b32.xlu1 %v950_v50, %s2044_s27 }
 0x1cc   :  { %1443 = vmatpush.bf16.msra.mxu3 %v2375_v37  ;;  %1517 = vmatpush.bf16.msrb.mxu0 %v2188_v7  ;;  %v978_v7 = vpop.f32.mrf.mxu2 }
 0x1ce   :  { %1547 = vmatpush.bf16.msrb.mxu2 %v2245_v10  ;;  %1532 = vmatpush.bf16.msrb.mxu1 %v2208_v28  ;;  %v2767_v8 = vpop.f32.mrf.mxu3  ;;  %v802_v28 = vpop.permute.xlu2 %801  ;;  %v821_v10 = vlaneseq }
 0x1d0   :  { %1444 = vmatpush.bf16.msra.mxu3 %v2386_v56  ;;  %1518 = vmatpush.bf16.msrb.mxu0 %v2206_v26 }
 0x1d1   :  { %1033 = vrot.lane.b32.xlu2 %v978_v7, %s2044_s27 }
 0x1d2   :  { %1548 = vmatpush.bf16.msrb.mxu2 %v2288_v59  ;;  %1533 = vmatpush.bf16.msrb.mxu1 %v2249_v15 }
 0x1d3   :  { %v2808_v59 = vpop.permute.xlu0 %797 }
 0x1d4   :  { %1445 = vmatpush.bf16.msra.mxu3 %v2396_v17  ;;  %1519 = vmatpush.bf16.msrb.mxu0 %v2247_v13  ;;  %v2793_v13 = vand.u32 127, %v821_v10  ;;  %v1004_v15 = vpop.f32.mrf.mxu0 }
 0x1d6   :  { %1549 = vmatpush.bf16.msrb.mxu2 %v2325_v49  ;;  %1534 = vmatpush.bf16.msrb.mxu1 %v2297_v3  ;;  %v925_v26 = vpop.f32.mrf.mxu3  ;;  %vm823_vm8 = vcmp.lt.s32.totalorder %v2793_v13, 127  ;;  %vm1047_vm9 = vcmp.lt.s32.totalorder %v2793_v13, 126  ;;  %vm1191_vm10 = vcmp.lt.s32.totalorder %v2793_v13, 125  ;;  %vm1335_vm11 = vcmp.lt.s32.totalorder %v2793_v13, 124 }
 0x1d7   :  { %v2813_v3 = vsel %vm823_vm8, %v2808_v59, %v802_v28  ;;  %vm1479_vm12 = vcmp.lt.s32.totalorder %v2793_v13, 123  ;;  %vm1623_vm13 = vcmp.lt.s32.totalorder %v2793_v13, 122 }
 0x1d8   :  { %1446 = vmatpush.bf16.msra.mxu3 %v2411_v45  ;;  %1520 = vmatpush.bf16.msrb.mxu0 %v2295_v2  ;;  %v808_v2 = vpop.permute.xlu2 %807 }
 0x1d9   :  { %1039 = vrot.lane.b32.xlu2 %v1004_v15, %s2044_s27 }
 0x1da   :  { %1550 = vmatpush.bf16.msrb.mxu2 %v2336_v63  ;;  %1535 = vmatpush.bf16.msrb.mxu1 %v2334_v62 }
 0x1dc   :  { %1447 = vmatpush.bf16.msra.mxu3 %v2427_v1  ;;  %1521 = vmatpush.bf16.msrb.mxu0 %v2332_v60  ;;  %v806_v60 = vpop.permute.xlu1 %805 }
 0x1dd   :  { %1963 = vmatmul.msk.bf16.vlgmr.msrb.gmra.mxu2 %vm709_vm7, %v2781_v20  ;;  %v830_v62 = vsel %vm823_vm8, %v802_v28, %v806_v60 }
 0x1de   :  { %1536 = vmatpush.bf16.msrb.mxu1 %v2342_v11 }
 0x1e0   :  { %1448 = vmatpush.bf16.msra.mxu3 %v2435_v31  ;;  %1522 = vmatpush.bf16.msrb.mxu0 %v2340_v9  ;;  %v814_v63 = vpop.permute.xlu2 %813  ;;  %v1092_v9 = vpop.f32.mrf.mxu2 }
 0x1e1   :  { %1962 = vmatmul.msk.bf16.vlgmr.msrb.gmra.mxu1 %vm709_vm7, %v2781_v20 }
 0x1e2   :  { %1586 = vmatpush.bf16.msra.mxu1 %v2348_v22 }
 0x1e3   :  { %1954 = vmatmul.msk.bf16.vlgmr.msra.gmra.mxu3 %vm709_vm7, %v2677_v0  ;;  %1961 = vmatmul.msk.bf16.vlgmr.msrb.gmra.mxu0 %vm709_vm7, %v2781_v20 }
 0x1e4   :  { %1558 = vmatpush.bf16.msrb.mxu3 %v2233_v54  ;;  %1572 = vmatpush.bf16.msra.mxu0 %v2346_v21  ;;  %v990_v54 = vpop.f32.mrf.mxu3  ;;  %v800_v21 = vpop.permute.xlu1 %799 }
 0x1e5   :  { %1035 = vrot.lane.b32.xlu0 %v990_v54, %s2044_s27 }
 0x1e6   :  { %1587 = vmatpush.bf16.msra.mxu1 %v2375_v37  ;;  %v1006_v37 = vpop.f32.mrf.mxu0 }
 0x1e8   :  { %1559 = vmatpush.bf16.msrb.mxu3 %v2268_v32  ;;  %1573 = vmatpush.bf16.msra.mxu0 %v2373_v41  ;;  %v964_v32 = vpop.f32.mrf.mxu1  ;;  %v820_v22 = vpop.permute.xlu2 %819 }
 0x1e9   :  { %v835_v41 = vsel %vm823_vm8, %v820_v22, %v800_v21 }
 0x1ea   :  { %1588 = vmatpush.bf16.msra.mxu1 %v2386_v56  ;;  %v1094_v56 = vpop.f32.mrf.mxu2 }
 0x1ec   :  { %1560 = vmatpush.bf16.msrb.mxu3 %v2310_v24  ;;  %1574 = vmatpush.bf16.msra.mxu0 %v2384_v55  ;;  %v992_v49 = vpop.f32.mrf.mxu3  ;;  %v2826_v24 = vadd.f32 %v2730_v46, %v830_v62  ;;  %v2841_v55 = vadd.f32 %v925_v26, %v835_v41 }
 0x1ed   :  { %1037 = vrot.lane.b32.xlu1 %v992_v49, %s2044_s27  ;;  %1029 = vrot.lane.b32.xlu0 %v964_v32, %s2044_s27 }
 0x1ee   :  { %1589 = vmatpush.bf16.msra.mxu1 %v2396_v17 }
 0x1f0   :  { %1561 = vmatpush.bf16.msrb.mxu3 %v2391_v12  ;;  %1575 = vmatpush.bf16.msra.mxu0 %v2393_v14  ;;  %v1018_v11 = vpop.f32.mrf.mxu1  ;;  %v1120_v14 = vpop.f32.mrf.mxu0 }
 0x1f2   :  { %1590 = vmatpush.bf16.msra.mxu1 %v2411_v45 }
 0x1f4   :  { %1562 = vmatpush.bf16.msrb.mxu3 %v2413_v61  ;;  %1576 = vmatpush.bf16.msra.mxu0 %v2415_v39  ;;  %v1148_v61 = vpop.f32.mrf.mxu2 }
 0x1f5   :  { %1167 = vrot.lane.b32.xlu0 %v1092_v9, %s2045_s1  ;;  %1043 = vrot.lane.b32.xlu1 %v1018_v11, %s2044_s27 }
 0x1f6   :  { %1591 = vmatpush.bf16.msra.mxu1 %v2427_v1  ;;  %v1106_v12 = vpop.f32.mrf.mxu3 }
 0x1f7   :  { %1171 = vrot.lane.b32.xlu2 %v1106_v12, %s2045_s1 }
 0x1f8   :  { %1563 = vmatpush.bf16.msrb.mxu3 %v2431_v29  ;;  %1577 = vmatpush.bf16.msra.mxu0 %v2433_v30  ;;  %v1020_v17 = vpop.f32.mrf.mxu1 }
 0x1f9   :  { %v810_v39 = vpop.permute.xlu0 %809 }
 0x1fa   :  { %1592 = vmatpush.bf16.msra.mxu1 %v2435_v31  ;;  %v2857_v1 = vsel %vm823_vm8, %v810_v39, %v814_v63  ;;  %v2861_v29 = vsel %vm823_vm8, %v806_v60, %v810_v39  ;;  %v1122_v31 = vpop.f32.mrf.mxu0 }
 0x1fc   :  { %1564 = vmatpush.bf16.msrb.mxu3 %v2441_v33  ;;  %1578 = vmatpush.bf16.msra.mxu0 %v2443_v53  ;;  %v1150_v35 = vpop.f32.mrf.mxu2 }
 0x1fd   :  { %1966 = vmatmul.msk.bf16.vlgmr.msra.gmra.mxu1 %vm709_vm7, %v2781_v20  ;;  %1041 = vrot.lane.b32.xlu0 %v1006_v37, %s2044_s27 }
 0x1fe   :  { %1169 = vrot.lane.b32.xlu1 %v1094_v56, %s2045_s1  ;;  %v1108_v45 = vpop.f32.mrf.mxu3 }
 0x1ff   :  { %1964 = vmatmul.msk.bf16.vlgmr.msrb.gmra.mxu3 %vm709_vm7, %v2781_v20  ;;  %1965 = vmatmul.msk.bf16.vlgmr.msra.gmra.mxu0 %vm709_vm7, %v2781_v20 }
 0x200   :  { %1045 = vrot.lane.b32.xlu2 %v1020_v17, %s2044_s27  ;;  %v1134_v30 = vpop.f32.mrf.mxu1  ;;  %v896_v17 = vadd.f32 %v2715_v25, %v2857_v1 }
 0x203   :  { %v812_v33 = vpop.permute.xlu1 %811  ;;  %v804_v53 = vpop.permute.xlu0 %803 }
 0x204   :  { %v2867_v42 = vsel %vm823_vm8, %v808_v2, %v812_v33  ;;  %v2871_v43 = vsel %vm823_vm8, %v804_v53, %v808_v2  ;;  %v2875_v44 = vsel %vm823_vm8, %v800_v21, %v804_v53 }
 0x205   :  { %1173 = vrot.lane.b32.xlu0 %v1108_v45, %s2045_s1  ;;  %v856_v25 = vadd.f32 %v2681_v6, %v2875_v44  ;;  %v870_v1 = vadd.f32 %v2751_v4, %v2871_v43 }
 0x206   :  { %1175 = vrot.lane.b32.xlu1 %v1120_v14, %s2045_s1  ;;  %v882_v14 = vadd.f32 %v2709_v18, %v2861_v29  ;;  %v884_v18 = vadd.f32 %v2723_v23, %v2867_v42 }
 0x208   :  { %1183 = vrot.lane.b32.xlu2 %v1148_v61, %s2045_s1  ;;  %v1136_v46 = vpop.f32.mrf.mxu1 }
 0x20b   :  { %v816_v58 = vpop.permute.xlu0 %815  ;;  %v818_v47 = vpop.permute.xlu1 %817 }
 0x20c   :  { %v2882_v48 = vsel %vm823_vm8, %v816_v58, %v820_v22  ;;  %v2886_v27 = vsel %vm823_vm8, %v812_v33, %v816_v58  ;;  %v1236_v34 = vpop.f32.mrf.mxu0  ;;  %v2890_v0 = vsel %vm823_vm8, %v814_v63, %v818_v47  ;;  %v2895_v5 = vsel %vm823_vm8, %v818_v47, %v2808_v59  ;;  %v1264_v40 = vpop.f32.mrf.mxu2 }
 0x20d   :  { %1179 = vrot.lane.b32.xlu0 %v1134_v30, %s2045_s1  ;;  %v854_v59 = vadd.f32 %v2661_v57, %v2813_v3 }
 0x210   :  { %1177 = vrot.lane.b32.xlu2 %v1122_v31, %s2045_s1  ;;  %v1250_v51 = vpop.f32.mrf.mxu1 }
 0x212   :  { %v1162_v38 = vpop.f32.mrf.mxu3 }
 0x213   :  { %1187 = vrot.lane.b32.xlu1 %v1162_v38, %s2045_s1 }
 0x214   :  { %v1238_v50 = vpop.f32.mrf.mxu0  ;;  %v1266_v7 = vpop.f32.mrf.mxu2 }
 0x215   :  { %1185 = vrot.lane.b32.xlu0 %v1150_v35, %s2045_s1 }
 0x218   :  { %v1252_v26 = vpop.f32.mrf.mxu1 }
 0x21a   :  { %v1164_v52 = vpop.f32.mrf.mxu3 }
 0x21b   :  { %1189 = vrot.lane.b32.xlu2 %v1164_v52, %s2045_s1  ;;  %1181 = vrot.lane.b32.xlu1 %v1136_v46, %s2045_s1 }
 0x21d   :  { %1311 = vrot.lane.b32.xlu0 %v1236_v34, %s2046_s30 }
 0x223   :  { %1319 = vrot.lane.b32.xlu1 %v1264_v40, %s2046_s30  ;;  %1315 = vrot.lane.b32.xlu2 %v1250_v51, %s2046_s30  ;;  %v1028_v10 = vpop.permute.xlu2 %1027  ;;  %v910_v51 = vadd.f32 %v2705_v16, %v2890_v0 }
 0x226   :  { %v1306_v57 = vpop.f32.mrf.mxu1 }
 0x228   :  { %v1292_v28 = vpop.f32.mrf.mxu0  ;;  %v1380_v63 = vpop.f32.mrf.mxu2 }
 0x22b   :  { %1313 = vrot.lane.b32.xlu1 %v1238_v50, %s2046_s30  ;;  %1321 = vrot.lane.b32.xlu2 %v1266_v7, %s2046_s30  ;;  %v2911_v32 = vpop.permute.xlu0 %1023  ;;  %v1034_v9 = vpop.permute.xlu2 %1033  ;;  %v924_v50 = vadd.f32 %v2767_v8, %v2895_v5 }
 0x22c   :  { %v1056_v60 = vsel %vm1047_vm9, %v2911_v32, %v1028_v10 }
 0x22d   :  { %v2921_v62 = vadd.f32 %v1056_v60, %v854_v59  ;;  %v898_v59 = vadd.f32 %v2732_v36, %v2886_v27  ;;  %v2049_v27 = vmov 0  }
 0x22e   :  { %v1278_v20 = vpop.f32.mrf.mxu3  ;;  %v1308_v41 = vpop.f32.mrf.mxu1  ;;  %2036 = vset.pattern.permute.xlu1 %v2049_v27  ;;  %2035 = vset.pattern.permute.xlu0 %v2049_v27 }
 0x22f   :  { %1323 = vrot.lane.b32.xlu0 %v1278_v20, %s2046_s30 }
 0x230   :  { %v1294_v3 = vpop.f32.mrf.mxu0  ;;  %v1382_v11 = vpop.f32.mrf.mxu2 }
 0x233   :  { %1327 = vrot.lane.b32.xlu2 %v1292_v28, %s2046_s30  ;;  %v1040_v22 = vpop.permute.xlu2 %1039 }
 0x235   :  { %v1032_v15 = vpop.permute.xlu1 %1031 }
 0x236   :  { %v1280_v54 = vpop.f32.mrf.mxu3  ;;  %v1054_v2 = vsel %vm1047_vm9, %v1028_v10, %v1032_v15 }
 0x237   :  { %1325 = vrot.lane.b32.xlu1 %v1280_v54, %s2046_s30  ;;  %1317 = vrot.lane.b32.xlu0 %v1252_v26, %s2046_s30  ;;  %v2916_v49 = vadd.f32 %v1054_v2, %v2826_v24  ;;  %v912_v2 = vadd.f32 %v2721_v19, %v2882_v48 }
 0x23d   :  { %v1026_v56 = vpop.permute.xlu1 %1025 }
 0x23f   :  { %1455 = vrot.lane.b32.xlu0 %v1380_v63, %s2047_s4  ;;  %1331 = vrot.lane.b32.xlu1 %v1306_v57, %s2046_s30 }
 0x242   :  { %v1422_v53 = vpop.f32.mrf.mxu1 }
 0x244   :  { %v1408_v21 = vpop.f32.mrf.mxu0  ;;  %v1436_v12 = vpop.f32.mrf.mxu2 }
 0x247   :  { %1329 = vrot.lane.b32.xlu0 %v1294_v3, %s2046_s30  ;;  %1457 = vrot.lane.b32.xlu1 %v1382_v11, %s2047_s4 }
 0x24a   :  { %v1394_v24 = vpop.f32.mrf.mxu3  ;;  %v1424_v52 = vpop.f32.mrf.mxu1 }
 0x24b   :  { %1459 = vrot.lane.b32.xlu2 %v1394_v24, %s2047_s4 }
 0x24c   :  { %v1438_v34 = vpop.f32.mrf.mxu2  ;;  %v1410_v46 = vpop.f32.mrf.mxu0 }
 0x24f   :  { %1463 = vrot.lane.b32.xlu1 %v1408_v21, %s2047_s4 }
 0x251   :  { %v1172_v33 = vpop.permute.xlu2 %1171 }
 0x252   :  { %v1396_v37 = vpop.f32.mrf.mxu3 }
 0x253   :  { %1461 = vrot.lane.b32.xlu0 %v1396_v37, %s2047_s4  ;;  %1333 = vrot.lane.b32.xlu2 %v1308_v41, %s2046_s30 }
 0x257   :  { %v1036_v45 = vpop.permute.xlu0 %1035 }
 0x258   :  { %v1050_v61 = vsel %vm1047_vm9, %v1036_v45, %v1040_v22  ;;  %v1052_v39 = vsel %vm1047_vm9, %v1032_v15, %v1036_v45 }
 0x259   :  { %v2939_v30 = vadd.f32 %v1052_v39, %v882_v14  ;;  %v2941_v31 = vadd.f32 %v1050_v61, %v896_v17 }
 0x25a   :  { %v1046_v44 = vpop.permute.xlu2 %1045 }
 0x25b   :  { %1471 = vrot.lane.b32.xlu2 %v1436_v12, %s2047_s4  ;;  %1467 = vrot.lane.b32.xlu0 %v1422_v53, %s2047_s4  ;;  %v1059_v4 = vsel %vm1047_vm9, %v1046_v44, %v1026_v56 }
 0x25c   :  { %v1071_v43 = vadd.f32 %v1059_v4, %v2841_v55 }
 0x25e   :  { %v1538_v15 = vpop.f32.mrf.mxu1 }
 0x25f   :  { %v1038_v29 = vpop.permute.xlu1 %1037  ;;  %v1030_v35 = vpop.permute.xlu0 %1029 }
 0x260   :  { %v1053_v38 = vsel %vm1047_vm9, %v1034_v9, %v1038_v29  ;;  %v1055_v58 = vsel %vm1047_vm9, %v1030_v35, %v1034_v9  ;;  %v1057_v47 = vsel %vm1047_vm9, %v1026_v56, %v1030_v35  ;;  %v1524_v0 = vpop.f32.mrf.mxu0  ;;  %v1552_v11 = vpop.f32.mrf.mxu2 }
 0x261   :  { %v2957_v23 = vadd.f32 %v1053_v38, %v884_v18  ;;  %v1066_v42 = vadd.f32 %v1057_v47, %v856_v25  ;;  %v1067_v6 = vadd.f32 %v1055_v58, %v870_v1 }
 0x262   :  { %v1184_v5 = vpop.permute.xlu2 %1183 }
 0x263   :  { %1465 = vrot.lane.b32.xlu2 %v1410_v46, %s2047_s4  ;;  %1473 = vrot.lane.b32.xlu0 %v1438_v34, %s2047_s4 }
 0x266   :  { %v1450_v40 = vpop.f32.mrf.mxu3  ;;  %v1540_v36 = vpop.f32.mrf.mxu1 }
 0x267   :  { %1475 = vrot.lane.b32.xlu1 %v1450_v40, %s2047_s4  ;;  %v2970_v7 = vpop.permute.xlu0 %1167  ;;  %v1044_v20 = vpop.permute.xlu1 %1043 }
 0x268   :  { %v1200_v55 = vsel %vm1191_vm10, %v2970_v7, %v1172_v33  ;;  %v1048_v26 = vsel %vm1047_vm9, %v1040_v22, %v1044_v20  ;;  %v1058_v28 = vsel %vm1047_vm9, %v1044_v20, %v2911_v32  ;;  %v1526_v24 = vpop.f32.mrf.mxu0  ;;  %v1554_v45 = vpop.f32.mrf.mxu2  ;;  %v1648_v20 = vld [vmem:[%s3191_s2] sm:$0xff] }
 0x269   :  { %v2981_v10 = vadd.f32 %v1200_v55, %v2921_v62  ;;  %v2983_v16 = vadd.f32 %v1048_v26, %v910_v51  ;;  %v1065_v8 = vadd.f32 %v1058_v28, %v924_v50  ;;  %v1649_v55 = vld [vmem:[%s3191_s2 + $0x8] sm:$0xff] }
 0x26a   :  { %v1178_v9 = vpop.permute.xlu2 %1177 }
 0x26b   :  { %1599 = vrot.lane.b32.xlu0 %v1524_v0, %s2048_s5 }
 0x26e   :  { %v1452_v54 = vpop.f32.mrf.mxu3 }
 0x26f   :  { %1477 = vrot.lane.b32.xlu2 %v1452_v54, %s2047_s4  ;;  %1469 = vrot.lane.b32.xlu1 %v1424_v52, %s2047_s4  ;;  %v1042_v32 = vpop.permute.xlu0 %1041 }
 0x270   :  { %v1170_v60 = vpop.permute.xlu1 %1169  ;;  %v1049_v62 = vsel %vm1047_vm9, %v1042_v32, %v1046_v44  ;;  %v1051_v63 = vsel %vm1047_vm9, %v1038_v29, %v1042_v32 }
 0x271   :  { %v2996_v57 = vadd.f32 %v1051_v63, %v898_v59  ;;  %v1070_v3 = vadd.f32 %v1049_v62, %v912_v2 }
 0x275   :  { %v1190_v56 = vpop.permute.xlu2 %1189 }
 0x276   :  { %v1203_v17 = vsel %vm1191_vm10, %v1190_v56, %v1170_v60 }
 0x277   :  { %1607 = vrot.lane.b32.xlu1 %v1552_v11, %s2048_s5  ;;  %1603 = vrot.lane.b32.xlu2 %v1538_v15, %s2048_s5  ;;  %v1174_v22 = vpop.permute.xlu0 %1173  ;;  %v3013_v61 = vadd.f32 %v1203_v17, %v1071_v43 }
 0x278   :  { %v1176_v19 = vpop.permute.xlu1 %1175  ;;  %v1199_v41 = vsel %vm1191_vm10, %v1174_v22, %v1178_v9  ;;  %v1201_v37 = vsel %vm1191_vm10, %v1170_v60, %v1174_v22 }
 0x279   :  { %v1198_v48 = vsel %vm1191_vm10, %v1172_v33, %v1176_v19  ;;  %v3007_v12 = vadd.f32 %v1201_v37, %v1066_v42  ;;  %v3009_v14 = vadd.f32 %v1199_v41, %v1067_v6 }
 0x27a   :  { %v1205_v21 = vadd.f32 %v1198_v48, %v2916_v49  ;;  %v1594_v49 = vpop.f32.mrf.mxu1 }
 0x27c   :  { %v1580_v25 = vpop.f32.mrf.mxu0 }
 0x27d   :  { %v1316_v47 = vpop.permute.xlu2 %1315 }
 0x27f   :  { %1601 = vrot.lane.b32.xlu1 %v1526_v24, %s2048_s5  ;;  %1609 = vrot.lane.b32.xlu2 %v1554_v45, %s2048_s5  ;;  %v1180_v33 = vpop.permute.xlu0 %1179 }
 0x280   :  { %v1194_v53 = vsel %vm1191_vm10, %v1180_v33, %v1184_v5  ;;  %v1196_v18 = vsel %vm1191_vm10, %v1176_v19, %v1180_v33 }
 0x281   :  { %v1206_v1 = vadd.f32 %v1196_v18, %v2939_v30  ;;  %v1207_v29 = vadd.f32 %v1194_v53, %v2941_v31 }
 0x282   :  { %v1566_v39 = vpop.f32.mrf.mxu3  ;;  %v1596_v58 = vpop.f32.mrf.mxu1 }
 0x283   :  { %1611 = vrot.lane.b32.xlu0 %v1566_v39, %s2048_s5 }
 0x284   :  { %v1582_v4 = vpop.f32.mrf.mxu0 }
 0x285   :  { %v1188_v46 = vpop.permute.xlu1 %1187  ;;  %v1322_v26 = vpop.permute.xlu2 %1321 }
 0x286   :  { %v1192_v30 = vsel %vm1191_vm10, %v1184_v5, %v1188_v46  ;;  %v1202_v31 = vsel %vm1191_vm10, %v1188_v46, %v2970_v7 }
 0x287   :  { %1615 = vrot.lane.b32.xlu2 %v1580_v25, %s2048_s5  ;;  %v1186_v38 = vpop.permute.xlu0 %1185  ;;  %v3035_v6 = vadd.f32 %v1192_v30, %v2983_v16  ;;  %v1209_v44 = vadd.f32 %v1202_v31, %v1065_v8 }
 0x288   :  { %v1193_v34 = vsel %vm1191_vm10, %v1186_v38, %v1190_v56 }
 0x289   :  { %v1214_v42 = vadd.f32 %v1193_v34, %v1070_v3 }
 0x28a   :  { %v1568_v35 = vpop.f32.mrf.mxu3 }
 0x28b   :  { %1613 = vrot.lane.b32.xlu1 %v1568_v35, %s2048_s5  ;;  %1605 = vrot.lane.b32.xlu0 %v1540_v36, %s2048_s5 }
 0x28d   :  { %v1182_v40 = vpop.permute.xlu1 %1181  ;;  %v1328_v5 = vpop.permute.xlu2 %1327 }
 0x28e   :  { %v1195_v50 = vsel %vm1191_vm10, %v1182_v40, %v1186_v38  ;;  %v1197_v7 = vsel %vm1191_vm10, %v1178_v9, %v1182_v40 }
 0x28f   :  { %1621 = vrot.lane.b32.xlu2 %v1596_v58, %s2048_s5  ;;  %v1312_v43 = vpop.permute.xlu0 %1311  ;;  %v1212_v28 = vadd.f32 %v1197_v7, %v2957_v23  ;;  %v1213_v16 = vadd.f32 %v1195_v50, %v2996_v57 }
 0x290   :  { %v1344_v52 = vsel %vm1335_vm11, %v1312_v43, %v1316_v47 }
 0x291   :  { %v1348_v51 = vadd.f32 %v1344_v52, %v2981_v10 }
 0x293   :  { %1617 = vrot.lane.b32.xlu0 %v1582_v4, %s2048_s5  ;;  %1619 = vrot.lane.b32.xlu1 %v1594_v49, %s2048_s5 }
 0x295   :  { %v1320_v10 = vpop.permute.xlu1 %1319 }
 0x296   :  { %v1342_v8 = vsel %vm1335_vm11, %v1316_v47, %v1320_v10 }
 0x297   :  { %v3058_v0 = vadd.f32 %v1342_v8, %v1205_v21 }
 0x29b   :  { %1652 = vperm.xlu0 %2035, %v1648_v20   ;;  %1657 = vperm.xlu1 %2036, %v1649_v55  }
 0x29d   :  { %v1314_v15 = vpop.permute.xlu1 %1313 }
 0x2a1   :  { %v1324_v54 = vpop.permute.xlu0 %1323 }
 0x2a2   :  { %v1338_v59 = vsel %vm1335_vm11, %v1324_v54, %v1328_v5  ;;  %v1340_v2 = vsel %vm1335_vm11, %v1320_v10, %v1324_v54 }
 0x2a3   :  { %v3064_v23 = vadd.f32 %v1340_v2, %v1206_v1  ;;  %v3066_v32 = vadd.f32 %v1338_v59, %v1207_v29 }
 0x2a5   :  { %v1460_v60 = vpop.permute.xlu2 %1459 }
 0x2a9   :  { %v1326_v62 = vpop.permute.xlu1 %1325  ;;  %v1318_v63 = vpop.permute.xlu0 %1317 }
 0x2aa   :  { %v1341_v57 = vsel %vm1335_vm11, %v1322_v26, %v1326_v62  ;;  %v1343_v3 = vsel %vm1335_vm11, %v1318_v63, %v1322_v26  ;;  %v1345_v9 = vsel %vm1335_vm11, %v1314_v15, %v1318_v63 }
 0x2ab   :  { %v3074_v11 = vadd.f32 %v1341_v57, %v1212_v28  ;;  %v1354_v36 = vadd.f32 %v1345_v9, %v3007_v12  ;;  %v1355_v27 = vadd.f32 %v1343_v3, %v3009_v14 }
 0x2ad   :  { %v1334_v19 = vpop.permute.xlu2 %1333 }
 0x2ae   :  { %v1347_v48 = vsel %vm1335_vm11, %v1334_v19, %v1314_v15 }
 0x2af   :  { %v1359_v24 = vadd.f32 %v1347_v48, %v3013_v61 }
 0x2b1   :  { %v1456_v21 = vpop.permute.xlu0 %1455  ;;  %v1332_v22 = vpop.permute.xlu1 %1331 }
 0x2b2   :  { %v1488_v41 = vsel %vm1479_vm12, %v1456_v21, %v1460_v60  ;;  %v1346_v37 = vsel %vm1335_vm11, %v1332_v22, %v1312_v43  ;;  %v1336_v20 = vsel %vm1335_vm11, %v1328_v5, %v1332_v22 }
 0x2b3   :  { %v1492_v56 = vadd.f32 %v1488_v41, %v1348_v51  ;;  %v1353_v12 = vadd.f32 %v1346_v37, %v1209_v44  ;;  %v1352_v54 = vadd.f32 %v1336_v20, %v3035_v6 }
 0x2b5   :  { %v1472_v17 = vpop.permute.xlu2 %1471 }
 0x2b9   :  { %v1330_v14 = vpop.permute.xlu0 %1329  ;;  %v1458_v53 = vpop.permute.xlu1 %1457 }
 0x2ba   :  { %v1337_v45 = vsel %vm1335_vm11, %v1330_v14, %v1334_v19  ;;  %v1339_v61 = vsel %vm1335_vm11, %v1326_v62, %v1330_v14 }
 0x2bb   :  { %v3090_v39 = vadd.f32 %v1339_v61, %v1213_v16  ;;  %v3092_v49 = vadd.f32 %v1337_v45, %v1214_v42 }
 0x2bd   :  { %v1466_v33 = vpop.permute.xlu2 %1465 }
 0x2c1   :  { %v1464_v35 = vpop.permute.xlu1 %1463 }
 0x2c2   :  { %v1486_v55 = vsel %vm1479_vm12, %v1460_v60, %v1464_v35 }
 0x2c3   :  { %v1493_v59 = vadd.f32 %v1486_v55, %v3058_v0 }
 0x2c5   :  { %v1462_v29 = vpop.permute.xlu0 %1461 }
 0x2c6   :  { %v1487_v28 = vsel %vm1479_vm12, %v1462_v29, %v1466_v33  ;;  %v1489_v16 = vsel %vm1479_vm12, %v1458_v53, %v1462_v29 }
 0x2c7   :  { %v1498_v62 = vadd.f32 %v1489_v16, %v1354_v36  ;;  %v1499_v63 = vadd.f32 %v1487_v28, %v1355_v27 }
 0x2c9   :  { %v1478_v18 = vpop.permute.xlu2 %1477 }
 0x2ca   :  { %v1491_v25 = vsel %vm1479_vm12, %v1478_v18, %v1458_v53 }
 0x2cb   :  { %v3096_v1 = vadd.f32 %v1491_v25, %v1359_v24 }
 0x2cd   :  { %v1468_v38 = vpop.permute.xlu0 %1467 }
 0x2ce   :  { %v1484_v10 = vsel %vm1479_vm12, %v1464_v35, %v1468_v38  ;;  %v1482_v8 = vsel %vm1479_vm12, %v1468_v38, %v1472_v17 }
 0x2cf   :  { %v1494_v57 = vadd.f32 %v1484_v10, %v3064_v23  ;;  %v1495_v9 = vadd.f32 %v1482_v8, %v3066_v32 }
 0x2d1   :  { %v1604_v44 = vpop.permute.xlu2 %1603 }
 0x2d5   :  { %v1474_v46 = vpop.permute.xlu0 %1473 }
 0x2d6   :  { %v1481_v14 = vsel %vm1479_vm12, %v1474_v46, %v1478_v18 }
 0x2d9   :  { %v1476_v58 = vpop.permute.xlu1 %1475  ;;  %v1610_v52 = vpop.permute.xlu2 %1609 }
 0x2da   :  { %v1490_v47 = vsel %vm1479_vm12, %v1476_v58, %v1456_v21  ;;  %v1480_v15 = vsel %vm1479_vm12, %v1472_v17, %v1476_v58 }
 0x2db   :  { %v1497_v34 = vadd.f32 %v1490_v47, %v1353_v12  ;;  %v1496_v19 = vadd.f32 %v1480_v15, %v1352_v54 }
 0x2dd   :  { %v1600_v31 = vpop.permute.xlu0 %1599 }
 0x2de   :  { %v1632_v5 = vsel %vm1623_vm13, %v1600_v31, %v1604_v44 }
 0x2df   :  { %v1636_v48 = vadd.f32 %v1632_v5, %v1492_v56 }
 0x2e1   :  { %v1470_v30 = vpop.permute.xlu1 %1469  ;;  %v1616_v26 = vpop.permute.xlu2 %1615 }
 0x2e2   :  { %v1483_v0 = vsel %vm1479_vm12, %v1470_v30, %v1474_v46  ;;  %v1485_v23 = vsel %vm1479_vm12, %v1466_v33, %v1470_v30 }
 0x2e3   :  { %v1500_v25 = vadd.f32 %v1485_v23, %v3074_v11  ;;  %v1501_v18 = vadd.f32 %v1483_v0, %v3090_v39  ;;  %v1502_v11 = vadd.f32 %v1481_v14, %v3092_v49 }
 0x2e9   :  { %v1608_v42 = vpop.permute.xlu1 %1607  ;;  %v1622_v29 = vpop.permute.xlu2 %1621 }
 0x2ea   :  { %v1630_v2 = vsel %vm1623_vm13, %v1604_v44, %v1608_v42 }
 0x2eb   :  { %v1637_v24 = vadd.f32 %v1630_v2, %v1493_v59 }
 0x2f1   :  { %v1602_v4 = vpop.permute.xlu1 %1601 }
 0x2f2   :  { %v1635_v30 = vsel %vm1623_vm13, %v1622_v29, %v1602_v4 }
 0x2f3   :  { %v1647_v13 = vadd.f32 %v1635_v30, %v3096_v1 }
 0x2f5   :  { %v1612_v43 = vpop.permute.xlu0 %1611 }
 0x2f6   :  { %v1628_v60 = vsel %vm1623_vm13, %v1608_v42, %v1612_v43  ;;  %v1626_v3 = vsel %vm1623_vm13, %v1612_v43, %v1616_v26 }
 0x2f7   :  { %v1638_v21 = vadd.f32 %v1628_v60, %v1494_v57  ;;  %v1639_v27 = vadd.f32 %v1626_v3, %v1495_v9 }
 0x2fd   :  { %v1614_v40 = vpop.permute.xlu1 %1613  ;;  %v1606_v51 = vpop.permute.xlu0 %1605 }
 0x2fe   :  { %v1631_v32 = vsel %vm1623_vm13, %v1606_v51, %v1610_v52  ;;  %v1633_v22 = vsel %vm1623_vm13, %v1602_v4, %v1606_v51  ;;  %v1629_v45 = vsel %vm1623_vm13, %v1610_v52, %v1614_v40 }
 0x2ff   :  { %v1642_v35 = vadd.f32 %v1633_v22, %v1498_v62  ;;  %v1643_v47 = vadd.f32 %v1631_v32, %v1499_v63  ;;  %v1644_v42 = vadd.f32 %v1629_v45, %v1500_v25 }
 0x305   :  { %v1618_v50 = vpop.permute.xlu0 %1617  ;;  %v1620_v7 = vpop.permute.xlu1 %1619 }
 0x306   :  { %v1624_v6 = vsel %vm1623_vm13, %v1616_v26, %v1620_v7  ;;  %v1634_v36 = vsel %vm1623_vm13, %v1620_v7, %v1600_v31  ;;  %v1627_v38 = vsel %vm1623_vm13, %v1614_v40, %v1618_v50 }
 0x307   :  { %v1640_v37 = vadd.f32 %v1624_v6, %v1496_v19  ;;  %v1641_v61 = vadd.f32 %v1634_v36, %v1497_v34  ;;  %v1625_v34 = vsel %vm1623_vm13, %v1618_v50, %v1622_v29  ;;  %v1645_v31 = vadd.f32 %v1627_v38, %v1501_v18 }
 0x308   :  { %v1646_v43 = vadd.f32 %v1625_v34, %v1502_v11 }
 0x30d   :  { %v1653_v41 = vpop.permute.xlu0 %1652  ;;  %v1658_v53 = vpop.permute.xlu1 %1657 }
 0x30e   :  { %v1660_v56 = vadd.f32 %v1653_v41, %v1636_v48  ;;  %v1661_v12 = vadd.f32 %v1653_v41, %v1637_v24  ;;  %v1662_v17 = vadd.f32 %v1653_v41, %v1638_v21  ;;  %v1663_v33 = vadd.f32 %v1653_v41, %v1639_v27 }
 0x30f   :  { %v1664_v58 = vadd.f32 %v1653_v41, %v1640_v37  ;;  %v1665_v46 = vadd.f32 %v1653_v41, %v1641_v61  ;;  %v1666_v39 = vadd.f32 %v1658_v53, %v1642_v35  ;;  %v1667_v44 = vadd.f32 %v1658_v53, %v1643_v47 }
 0x310   :  { %1672 = vst [vmem:[%s3192_s3] sm:$0xff] %v1660_v56  ;;  %v1668_v49 = vadd.f32 %v1658_v53, %v1644_v42  ;;  %v1669_v4 = vadd.f32 %v1658_v53, %v1645_v31  ;;  %v1670_v52 = vadd.f32 %v1658_v53, %v1646_v43  ;;  %v1671_v40 = vadd.f32 %v1658_v53, %v1647_v13 }
 0x311   :  { %1673 = vst [vmem:[%s3192_s3 + $0x8] sm:$0xff] %v1661_v12 }
 0x312   :  { %1674 = vst [vmem:[%s3192_s3 + $0x10] sm:$0xff] %v1662_v17 }
 0x313   :  { %1967 = vst [vmem:[%s3192_s3 + $0x30] sm:$0xff] %v1663_v33 }
 0x314   :  { %1968 = vst [vmem:[%s3192_s3 + $0x38] sm:$0xff] %v1664_v58 }
 0x315   :  { %1969 = vst [vmem:[%s3192_s3 + $0x40] sm:$0xff] %v1665_v46 }
 0x316   :  { %1675 = vst [vmem:[%s3192_s3 + $0x18] sm:$0xff] %v1666_v39 }
 0x317   :  { %1676 = vst [vmem:[%s3192_s3 + $0x20] sm:$0xff] %v1667_v44 }
 0x318   :  { %1677 = vst [vmem:[%s3192_s3 + $0x28] sm:$0xff] %v1668_v49 }
 0x319   :  { %1970 = vst [vmem:[%s3192_s3 + $0x48] sm:$0xff] %v1669_v4 }
 0x31a   :  { %1971 = vst [vmem:[%s3192_s3 + $0x50] sm:$0xff] %v1670_v52 }
 0x31b   :  { %1972 = vst [vmem:[%s3192_s3 + $0x58] sm:$0xff] %v1671_v40 }

</bundles_post_ra>
